<compile_context>
chip_gen: v7x
topology: tpu7x:2x2x1
jax: 0.10.0
libtpu: 0.0.40
codegen_flags: <defaults>
</compile_context>

<pallas_src>
import math
import numpy as np
import jax
import jax.numpy as jnp
from jax.experimental import pallas as pl
from jax.experimental.pallas import tpu as pltpu

LEAK_RATE = 0.3
SPECTRAL_RADIUS = 0.1

# Pin full-f32 MXU behaviour explicitly (see header note).
_F32_PREC = jax.lax.Precision.HIGHEST


def _make_reservoir_kernel(T: int):
    def kernel(u_ref, win_t_ref, w_t_ref, wout_t_ref, b_ref, y_ref):
        R = w_t_ref.shape[0]

        # Project all timestep inputs at once on the MXU: (T, I) @ (I, R) -> (T, R).
        # Off the serial chain; computed once up front.
        u_proj = jnp.dot(u_ref[...], win_t_ref[...],
                         preferred_element_type=jnp.float32,
                         precision=_F32_PREC)

        # Load the recurrent weights once; loop-invariant so the RHS weight
        # push can stay resident in the MXU across all T steps.
        w_t = w_t_ref[...]

        # Zero initial reservoir state (reset_state=True), carried as a value
        # in vregs — never spilled to VMEM inside the recurrence.
        state = jnp.zeros((1, R), dtype=jnp.float32)

        # Sequential recurrence over time (inherently serial); T is small and
        # static, so statically unroll and collect per-step states as values.
        states = []
        for t in range(T):
            pre = u_proj[t:t + 1, :] + jnp.dot(
                state, w_t,
                preferred_element_type=jnp.float32,
                precision=_F32_PREC)
            new_state = jnp.tanh(pre)                       # EUP tanh
            state = (1.0 - LEAK_RATE) * state + LEAK_RATE * new_state
            states.append(state)

        # Readout (nn.Linear): (T, R) @ (R, O_pad) + b — one dot on all states.
        # O_pad is a multiple of 128, so the final store is an unmasked full-tile vst.
        X = jnp.concatenate(states, axis=0)                 # (T, R) in vregs
        y_ref[...] = (jnp.dot(X, wout_t_ref[...],
                              preferred_element_type=jnp.float32,
                              precision=_F32_PREC)
                      + b_ref[...]).astype(y_ref.dtype)
    return kernel


def reservoir_forward(u, W_in, W, W_out, b_out):
    """u: (T, I); W_in: (R, I); W: (R, R); W_out: (O, R); b_out: (O,) -> (T, O)."""
    T, _ = u.shape
    O, R = W_out.shape

    # Pad the readout output dim to a lane-dense multiple of 128 (unmasked
    # stores in the kernel epilogue); slice back afterwards.
    O_pad = ((O + 127) // 128) * 128

    wout_t_pad = jnp.zeros((R, O_pad), jnp.float32).at[:, :O].set(
        W_out.T.astype(jnp.float32))
    b_pad = jnp.zeros((1, O_pad), jnp.float32).at[0, :O].set(
        b_out.astype(jnp.float32))

    vm = pl.BlockSpec(memory_space=pltpu.MemorySpace.VMEM)
    y_pad = pl.pallas_call(
        _make_reservoir_kernel(T),
        out_shape=jax.ShapeDtypeStruct((T, O_pad), jnp.float32),
        in_specs=[vm, vm, vm, vm, vm],
        out_specs=vm,
    )(u.astype(jnp.float32),
      W_in.T.astype(jnp.float32),
      W.T.astype(jnp.float32),
      wout_t_pad,
      b_pad)
    return y_pad[:, :O]


def _numpy_reference(u, W_in, W, W_out, b_out):
    u, W_in, W, W_out, b_out = map(np.asarray, (u, W_in, W, W_out, b_out))
    T = u.shape[0]
    R = W.shape[0]
    state = np.zeros((R,), np.float32)
    states = []
    for t in range(T):
        new_state = np.tanh(W_in @ u[t] + W @ state)
        state = (1.0 - LEAK_RATE) * state + LEAK_RATE * new_state
        states.append(state.copy())
    X = np.stack(states)
    return X @ W_out.T + b_out


if __name__ == "__main__":
    # Small shapes consistent with the module's forward: u is (T, input_dim).
    T, INPUT_DIM, RESERVOIR_DIM, OUTPUT_DIM = 8, 16, 128, 8

    key = jax.random.PRNGKey(0)
    k_in, k_w, k_mask, k_wout, k_bout, k_u = jax.random.split(key, 6)

    # Deterministic parameter init mirroring Reservoir.__init__:
    W_in = jax.random.normal(k_in, (RESERVOIR_DIM, INPUT_DIM),
                             dtype=jnp.float32) * 0.1
    W = jax.random.uniform(k_w, (RESERVOIR_DIM, RESERVOIR_DIM),
                           dtype=jnp.float32) * 2.0 - 1.0
    sparsity_mask = jax.random.uniform(
        k_mask, (RESERVOIR_DIM, RESERVOIR_DIM), dtype=jnp.float32) < 0.95
    W = jnp.where(sparsity_mask, 0.0, W)
    # Spectral-radius scaling (eig done on host with numpy; init-time glue,
    # no Pallas equivalent needed).
    eigvals = np.linalg.eigvals(np.asarray(W, dtype=np.float64))
    max_eig = float(np.max(np.abs(eigvals)))
    if max_eig < 1e-12:
        max_eig = 1.0
    W = W * (SPECTRAL_RADIUS / max_eig)

    # nn.Linear(reservoir_dim, output_dim) default init: U(-1/sqrt(R), 1/sqrt(R))
    bound = 1.0 / math.sqrt(RESERVOIR_DIM)
    W_out = jax.random.uniform(k_wout, (OUTPUT_DIM, RESERVOIR_DIM),
                               minval=-bound, maxval=bound, dtype=jnp.float32)
    b_out = jax.random.uniform(k_bout, (OUTPUT_DIM,),
                               minval=-bound, maxval=bound, dtype=jnp.float32)

    # Example input sequence.
    u = jax.random.normal(k_u, (T, INPUT_DIM), dtype=jnp.float32)

    y = reservoir_forward(u, W_in, W, W_out, b_out)
    y = jax.block_until_ready(y)
    assert y.shape == (T, OUTPUT_DIM)

    y_ref = _numpy_reference(u, W_in, W, W_out, b_out)
    np.testing.assert_allclose(np.asarray(y), y_ref, rtol=1e-4, atol=1e-4)

    print("KERNEL_OK")
</pallas_src>

<mosaic_0001>
module attributes {stable_mosaic.version = 11 : i64} {
  func.func @kernel(%arg0: memref<8x16xf32, #tpu.memory_space<vmem>>, %arg1: memref<16x128xf32, #tpu.memory_space<vmem>>, %arg2: memref<128x128xf32, #tpu.memory_space<vmem>>, %arg3: memref<128x128xf32, #tpu.memory_space<vmem>>, %arg4: memref<1x128xf32, #tpu.memory_space<vmem>>, %arg5: memref<8x128xf32, #tpu.memory_space<vmem>>) attributes {dimension_semantics = [], scalar_prefetch = 0 : i64, scratch_operands = 0 : i64, tpu.core_type = #tpu.core_type<tc>} {
    %c0 = arith.constant 0 : index
    %c0_0 = arith.constant 0 : index
    %0 = vector.load %arg0[%c0, %c0_0] : memref<8x16xf32, #tpu.memory_space<vmem>>, vector<8x16xf32>
    %c0_1 = arith.constant 0 : index
    %c0_2 = arith.constant 0 : index
    %1 = vector.load %arg1[%c0_1, %c0_2] : memref<16x128xf32, #tpu.memory_space<vmem>>, vector<16x128xf32>
    %cst = arith.constant dense<0.000000e+00> : vector<8x128xf32>
    %2 = tpu.matmul %0, %1, %cst {dimension_numbers = #tpu.dot_dimension_numbers<[1], [0], [0], [1], [0, 0, 1, 1], [], []>, precision = #tpu.contract_precision<fp32>} : vector<8x16xf32>, vector<16x128xf32>, vector<8x128xf32> -> vector<8x128xf32>
    %c0_3 = arith.constant 0 : index
    %c0_4 = arith.constant 0 : index
    %3 = vector.load %arg2[%c0_3, %c0_4] : memref<128x128xf32, #tpu.memory_space<vmem>>, vector<128x128xf32>
    %cst_5 = arith.constant 0.000000e+00 : f32
    %4 = vector.broadcast %cst_5 : f32 to vector<1x128xf32>
    %5 = vector.extract_strided_slice %2 {offsets = [0, 0], sizes = [1, 128], strides = [1, 1]} : vector<8x128xf32> to vector<1x128xf32>
    %cst_6 = arith.constant dense<0.000000e+00> : vector<1x128xf32>
    %6 = tpu.matmul %4, %3, %cst_6 {dimension_numbers = #tpu.dot_dimension_numbers<[1], [0], [0], [1], [0, 0, 1, 1], [], []>, precision = #tpu.contract_precision<fp32>} : vector<1x128xf32>, vector<128x128xf32>, vector<1x128xf32> -> vector<1x128xf32>
    %7 = arith.addf %5, %6 : vector<1x128xf32>
    %8 = math.tanh %7 : vector<1x128xf32>
    %cst_7 = arith.constant 0.699999988 : f32
    %9 = vector.broadcast %cst_7 : f32 to vector<1x128xf32>
    %10 = arith.mulf %9, %4 : vector<1x128xf32>
    %cst_8 = arith.constant 3.000000e-01 : f32
    %11 = vector.broadcast %cst_8 : f32 to vector<1x128xf32>
    %12 = arith.mulf %11, %8 : vector<1x128xf32>
    %13 = arith.addf %10, %12 : vector<1x128xf32>
    %14 = vector.extract_strided_slice %2 {offsets = [1, 0], sizes = [1, 128], strides = [1, 1]} : vector<8x128xf32> to vector<1x128xf32>
    %cst_9 = arith.constant dense<0.000000e+00> : vector<1x128xf32>
    %15 = tpu.matmul %13, %3, %cst_9 {dimension_numbers = #tpu.dot_dimension_numbers<[1], [0], [0], [1], [0, 0, 1, 1], [], []>, precision = #tpu.contract_precision<fp32>} : vector<1x128xf32>, vector<128x128xf32>, vector<1x128xf32> -> vector<1x128xf32>
    %16 = arith.addf %14, %15 : vector<1x128xf32>
    %17 = math.tanh %16 : vector<1x128xf32>
    %cst_10 = arith.constant 0.699999988 : f32
    %18 = vector.broadcast %cst_10 : f32 to vector<1x128xf32>
    %19 = arith.mulf %18, %13 : vector<1x128xf32>
    %cst_11 = arith.constant 3.000000e-01 : f32
    %20 = vector.broadcast %cst_11 : f32 to vector<1x128xf32>
    %21 = arith.mulf %20, %17 : vector<1x128xf32>
    %22 = arith.addf %19, %21 : vector<1x128xf32>
    %23 = vector.extract_strided_slice %2 {offsets = [2, 0], sizes = [1, 128], strides = [1, 1]} : vector<8x128xf32> to vector<1x128xf32>
    %cst_12 = arith.constant dense<0.000000e+00> : vector<1x128xf32>
    %24 = tpu.matmul %22, %3, %cst_12 {dimension_numbers = #tpu.dot_dimension_numbers<[1], [0], [0], [1], [0, 0, 1, 1], [], []>, precision = #tpu.contract_precision<fp32>} : vector<1x128xf32>, vector<128x128xf32>, vector<1x128xf32> -> vector<1x128xf32>
    %25 = arith.addf %23, %24 : vector<1x128xf32>
    %26 = math.tanh %25 : vector<1x128xf32>
    %cst_13 = arith.constant 0.699999988 : f32
    %27 = vector.broadcast %cst_13 : f32 to vector<1x128xf32>
    %28 = arith.mulf %27, %22 : vector<1x128xf32>
    %cst_14 = arith.constant 3.000000e-01 : f32
    %29 = vector.broadcast %cst_14 : f32 to vector<1x128xf32>
    %30 = arith.mulf %29, %26 : vector<1x128xf32>
    %31 = arith.addf %28, %30 : vector<1x128xf32>
    %32 = vector.extract_strided_slice %2 {offsets = [3, 0], sizes = [1, 128], strides = [1, 1]} : vector<8x128xf32> to vector<1x128xf32>
    %cst_15 = arith.constant dense<0.000000e+00> : vector<1x128xf32>
    %33 = tpu.matmul %31, %3, %cst_15 {dimension_numbers = #tpu.dot_dimension_numbers<[1], [0], [0], [1], [0, 0, 1, 1], [], []>, precision = #tpu.contract_precision<fp32>} : vector<1x128xf32>, vector<128x128xf32>, vector<1x128xf32> -> vector<1x128xf32>
    %34 = arith.addf %32, %33 : vector<1x128xf32>
    %35 = math.tanh %34 : vector<1x128xf32>
    %cst_16 = arith.constant 0.699999988 : f32
    %36 = vector.broadcast %cst_16 : f32 to vector<1x128xf32>
    %37 = arith.mulf %36, %31 : vector<1x128xf32>
    %cst_17 = arith.constant 3.000000e-01 : f32
    %38 = vector.broadcast %cst_17 : f32 to vector<1x128xf32>
    %39 = arith.mulf %38, %35 : vector<1x128xf32>
    %40 = arith.addf %37, %39 : vector<1x128xf32>
    %41 = vector.extract_strided_slice %2 {offsets = [4, 0], sizes = [1, 128], strides = [1, 1]} : vector<8x128xf32> to vector<1x128xf32>
    %cst_18 = arith.constant dense<0.000000e+00> : vector<1x128xf32>
    %42 = tpu.matmul %40, %3, %cst_18 {dimension_numbers = #tpu.dot_dimension_numbers<[1], [0], [0], [1], [0, 0, 1, 1], [], []>, precision = #tpu.contract_precision<fp32>} : vector<1x128xf32>, vector<128x128xf32>, vector<1x128xf32> -> vector<1x128xf32>
    %43 = arith.addf %41, %42 : vector<1x128xf32>
    %44 = math.tanh %43 : vector<1x128xf32>
    %cst_19 = arith.constant 0.699999988 : f32
    %45 = vector.broadcast %cst_19 : f32 to vector<1x128xf32>
    %46 = arith.mulf %45, %40 : vector<1x128xf32>
    %cst_20 = arith.constant 3.000000e-01 : f32
    %47 = vector.broadcast %cst_20 : f32 to vector<1x128xf32>
    %48 = arith.mulf %47, %44 : vector<1x128xf32>
    %49 = arith.addf %46, %48 : vector<1x128xf32>
    %50 = vector.extract_strided_slice %2 {offsets = [5, 0], sizes = [1, 128], strides = [1, 1]} : vector<8x128xf32> to vector<1x128xf32>
    %cst_21 = arith.constant dense<0.000000e+00> : vector<1x128xf32>
    %51 = tpu.matmul %49, %3, %cst_21 {dimension_numbers = #tpu.dot_dimension_numbers<[1], [0], [0], [1], [0, 0, 1, 1], [], []>, precision = #tpu.contract_precision<fp32>} : vector<1x128xf32>, vector<128x128xf32>, vector<1x128xf32> -> vector<1x128xf32>
    %52 = arith.addf %50, %51 : vector<1x128xf32>
    %53 = math.tanh %52 : vector<1x128xf32>
    %cst_22 = arith.constant 0.699999988 : f32
    %54 = vector.broadcast %cst_22 : f32 to vector<1x128xf32>
    %55 = arith.mulf %54, %49 : vector<1x128xf32>
    %cst_23 = arith.constant 3.000000e-01 : f32
    %56 = vector.broadcast %cst_23 : f32 to vector<1x128xf32>
    %57 = arith.mulf %56, %53 : vector<1x128xf32>
    %58 = arith.addf %55, %57 : vector<1x128xf32>
    %59 = vector.extract_strided_slice %2 {offsets = [6, 0], sizes = [1, 128], strides = [1, 1]} : vector<8x128xf32> to vector<1x128xf32>
    %cst_24 = arith.constant dense<0.000000e+00> : vector<1x128xf32>
    %60 = tpu.matmul %58, %3, %cst_24 {dimension_numbers = #tpu.dot_dimension_numbers<[1], [0], [0], [1], [0, 0, 1, 1], [], []>, precision = #tpu.contract_precision<fp32>} : vector<1x128xf32>, vector<128x128xf32>, vector<1x128xf32> -> vector<1x128xf32>
    %61 = arith.addf %59, %60 : vector<1x128xf32>
    %62 = math.tanh %61 : vector<1x128xf32>
    %cst_25 = arith.constant 0.699999988 : f32
    %63 = vector.broadcast %cst_25 : f32 to vector<1x128xf32>
    %64 = arith.mulf %63, %58 : vector<1x128xf32>
    %cst_26 = arith.constant 3.000000e-01 : f32
    %65 = vector.broadcast %cst_26 : f32 to vector<1x128xf32>
    %66 = arith.mulf %65, %62 : vector<1x128xf32>
    %67 = arith.addf %64, %66 : vector<1x128xf32>
    %68 = vector.extract_strided_slice %2 {offsets = [7, 0], sizes = [1, 128], strides = [1, 1]} : vector<8x128xf32> to vector<1x128xf32>
    %cst_27 = arith.constant dense<0.000000e+00> : vector<1x128xf32>
    %69 = tpu.matmul %67, %3, %cst_27 {dimension_numbers = #tpu.dot_dimension_numbers<[1], [0], [0], [1], [0, 0, 1, 1], [], []>, precision = #tpu.contract_precision<fp32>} : vector<1x128xf32>, vector<128x128xf32>, vector<1x128xf32> -> vector<1x128xf32>
    %70 = arith.addf %68, %69 : vector<1x128xf32>
    %71 = math.tanh %70 : vector<1x128xf32>
    %cst_28 = arith.constant 0.699999988 : f32
    %72 = vector.broadcast %cst_28 : f32 to vector<1x128xf32>
    %73 = arith.mulf %72, %67 : vector<1x128xf32>
    %cst_29 = arith.constant 3.000000e-01 : f32
    %74 = vector.broadcast %cst_29 : f32 to vector<1x128xf32>
    %75 = arith.mulf %74, %71 : vector<1x128xf32>
    %76 = arith.addf %73, %75 : vector<1x128xf32>
    %77 = tpu.concatenate %13, %22, %31, %40, %49, %58, %67, %76 in 0 : vector<1x128xf32>, vector<1x128xf32>, vector<1x128xf32>, vector<1x128xf32>, vector<1x128xf32>, vector<1x128xf32>, vector<1x128xf32>, vector<1x128xf32> -> vector<8x128xf32>
    %c0_30 = arith.constant 0 : index
    %c0_31 = arith.constant 0 : index
    %78 = vector.load %arg3[%c0_30, %c0_31] : memref<128x128xf32, #tpu.memory_space<vmem>>, vector<128x128xf32>
    %cst_32 = arith.constant dense<0.000000e+00> : vector<8x128xf32>
    %79 = tpu.matmul %77, %78, %cst_32 {dimension_numbers = #tpu.dot_dimension_numbers<[1], [0], [0], [1], [0, 0, 1, 1], [], []>, precision = #tpu.contract_precision<fp32>} : vector<8x128xf32>, vector<128x128xf32>, vector<8x128xf32> -> vector<8x128xf32>
    %c0_33 = arith.constant 0 : index
    %c0_34 = arith.constant 0 : index
    %80 = vector.load %arg4[%c0_33, %c0_34] : memref<1x128xf32, #tpu.memory_space<vmem>>, vector<1x128xf32>
    %81 = vector.broadcast %80 : vector<1x128xf32> to vector<8x128xf32>
    %82 = arith.addf %79, %81 : vector<8x128xf32>
    %c0_35 = arith.constant 0 : index
    %c0_36 = arith.constant 0 : index
    %83 = vector.load %arg5[%c0_35, %c0_36] : memref<8x128xf32, #tpu.memory_space<vmem>>, vector<8x128xf32>
    tpu.vector_store %arg5[%c0_35, %c0_36], %82 {strides = array<i32>} : memref<8x128xf32, #tpu.memory_space<vmem>>, vector<8x128xf32>,
    return
  }
}

</mosaic_0001>

<bundles_post_ra>
// kernel: tpu_custom_call.1
= control target key start
LH: loop header
LB: loop body
LE: loop exit
PB: predicated region body
PF: predicated region fallthrough
CT: control target
= control target key end

     0   :  { %10 = vsyncpa [#allocation3], 0  ;;  %s12579_s0 = inlined_call_operand.hbm [shape: f32[8,16], index: 0, kind: input, shape index: {}]   ;;  %s12580_s1 = inlined_call_operand.hbm [shape: f32[16,128], index: 1, kind: input, shape index: {}]   ;;  %s12581_s2 = inlined_call_operand.hbm [shape: f32[128,128], index: 2, kind: input, shape index: {}]   ;;  %s12582_s3 = inlined_call_operand.hbm [shape: f32[128,128], index: 3, kind: input, shape index: {}]   ;;  %s12583_s4 = inlined_call_operand.vmem [shape: f32[1,128], index: 4, kind: input, shape index: {}]   ;;  %s12584_s5 = inlined_call_operand.hbm [shape: f32[8,128], index: 5, kind: output, shape index: {}]  }
   0x1   :  { %11 = vsyncpa [#allocation6], 0 }
   0x2   :  { %12 = vsyncpa [#allocation9], 0 }
   0x3   :  { %13 = vsyncpa [#allocation4], 0  ;;  %s10886_s18 = smov [#allocation5]   ;;  %s10768_s22 = scalar_lea.hbm %s12580_s1, 256 }
   0x4   :  { %s29_s19 = sshll.u32 %s10886_s18, 4  ;;  %p10769_p0 = scmp.ne.s32.totalorder %s12580_s1, %s10768_s22  ;;  %s30_s19 = int_to_ptr.vmem [resolvable:$true] %s29_s19 }
   0x5   :  { %p10772_p1 = scmp.lt.u32.totalorder %s10768_s22, %s12580_s1 }
   0x7   :  { %p10774_p2 = pnand %p10772_p1, %p10769_p0 }
   0x9   :  { %10777 = shalt.err (!%p10774_p2)
}
   0xa   :  { %s10778_s27 = scalar_lea.vmem %s30_s19, 256  ;;  %p10783_p4 = scmp.lt.s32.totalorder %s30_s19, %s30_s19 }
   0xb   :  { %p10779_p3 = scmp.ne.s32.totalorder %s30_s19, %s10778_s27  ;;  %p10784_p5 = scmp.lt.s32.totalorder %s10778_s27, %s10778_s27 }
   0xd   :  { %p10785_p6 = por %p10784_p5, %p10783_p4 }
   0xf   :  { %p10786_p7 = pnand %p10785_p6, %p10779_p3 }
  0x11   :  { %10789 = shalt.err (!%p10786_p7)
}
  0x12   :  { %s10887_s28 = smov 128   ;;  %s10888_s29 = smov 8  }
  0x13   :  { %35 = dma.hbm_to_vmem [thread:$0]  %s12580_s1, 256, %s30_s19, [#allocation6], %s10887_s28, %s10887_s28, %s10888_s29  }
  0x14   :  { %s10889_s7 = smov [#allocation2]   ;;  %s10890_s9 = smov [#allocation7]  }
  0x15   :  { %s20_s8 = sshll.u32 %s10889_s7, 4  ;;  %s41_s10 = sshll.u32 %s10890_s9, 4  ;;  %s21_s8 = int_to_ptr.vmem [resolvable:$true] %s20_s8  ;;  %s42_s10 = int_to_ptr.vmem [resolvable:$true] %s41_s10 }
  0x16   :  { %s10790_s13 = scalar_lea.hbm %s12579_s0, 128 }
  0x17   :  { %p10791_p8 = scmp.ne.s32.totalorder %s12579_s0, %s10790_s13  ;;  %p10794_p9 = scmp.lt.u32.totalorder %s10790_s13, %s12579_s0 }
  0x19   :  { %p10796_p10 = pnand %p10794_p9, %p10791_p8 }
  0x1b   :  { %10799 = shalt.err (!%p10796_p10)
}
  0x1c   :  { %s10800_s1 = scalar_lea.vmem %s21_s8, 128  ;;  %p10805_p12 = scmp.lt.s32.totalorder %s21_s8, %s21_s8 }
  0x1d   :  { %p10801_p11 = scmp.ne.s32.totalorder %s21_s8, %s10800_s1  ;;  %p10806_p13 = scmp.lt.s32.totalorder %s10800_s1, %s10800_s1 }
  0x1f   :  { %p10807_p0 = por %p10806_p13, %p10805_p12 }
  0x21   :  { %p10808_p1 = pnand %p10807_p0, %p10801_p11 }
  0x23   :  { %10811 = shalt.err (!%p10808_p1)
}
  0x24   :  { %23 = dma.hbm_to_vmem [thread:$0]  %s12579_s0, 128, %s21_s8, [#allocation3]  }
  0x25   :  { %s10812_s22 = scalar_lea.hbm %s12581_s2, 2048 }
  0x26   :  { %p10813_p2 = scmp.ne.s32.totalorder %s12581_s2, %s10812_s22  ;;  %p10816_p3 = scmp.lt.u32.totalorder %s10812_s22, %s12581_s2 }
  0x28   :  { %p10818_p4 = pnand %p10816_p3, %p10813_p2 }
  0x2a   :  { %10821 = shalt.err (!%p10818_p4)
}
  0x2b   :  { %s10822_s27 = scalar_lea.vmem %s42_s10, 2048  ;;  %p10827_p6 = scmp.lt.s32.totalorder %s42_s10, %s42_s10 }
  0x2c   :  { %p10823_p5 = scmp.ne.s32.totalorder %s42_s10, %s10822_s27  ;;  %p10828_p7 = scmp.lt.s32.totalorder %s10822_s27, %s10822_s27 }
  0x2e   :  { %p10829_p8 = por %p10828_p7, %p10827_p6 }
  0x30   :  { %p10830_p9 = pnand %p10829_p8, %p10823_p5 }
  0x32   :  { %10833 = shalt.err (!%p10830_p9)
}
  0x33   :  { %47 = dma.hbm_to_vmem [thread:$0]  %s12581_s2, 2048, %s42_s10, [#allocation6], %s10887_s28, %s10887_s28, %s10888_s29  }
  0x34   :  { %s10891_s6 = smov [#allocation8]   ;;  %s10834_s11 = scalar_lea.hbm %s12582_s3, 2048 }
  0x35   :  { %s53_s7 = sshll.u32 %s10891_s6, 4  ;;  %p10835_p10 = scmp.ne.s32.totalorder %s12582_s3, %s10834_s11  ;;  %s54_s7 = int_to_ptr.vmem [resolvable:$true] %s53_s7 }
  0x36   :  { %p10838_p11 = scmp.lt.u32.totalorder %s10834_s11, %s12582_s3 }
  0x38   :  { %p10840_p12 = pnand %p10838_p11, %p10835_p10 }
  0x3a   :  { %10843 = shalt.err (!%p10840_p12)
}
  0x3b   :  { %s10844_s16 = scalar_lea.vmem %s54_s7, 2048  ;;  %p10849_p0 = scmp.lt.s32.totalorder %s54_s7, %s54_s7 }
  0x3c   :  { %p10845_p13 = scmp.ne.s32.totalorder %s54_s7, %s10844_s16  ;;  %p10850_p1 = scmp.lt.s32.totalorder %s10844_s16, %s10844_s16 }
  0x3e   :  { %p10851_p2 = por %p10850_p1, %p10849_p0 }
  0x40   :  { %p10852_p3 = pnand %p10851_p2, %p10845_p13 }
  0x42   :  { %10855 = shalt.err (!%p10852_p3)
}
  0x43   :  { %59 = dma.hbm_to_vmem [thread:$0]  %s12582_s3, 2048, %s54_s7, [#allocation9], %s10887_s28, %s10887_s28, %s10888_s29  }
  0x44   :  { %10878 = dma.done.wait [#allocation3], 128  }
  0x45   :  { %10879 = vsyncadd [#allocation3], 4294967168 }
  0x46   :  { %10880 = dma.done.wait [#allocation6], 2304  }
  0x47   :  { %10881 = vsyncadd [#allocation6], 4294964992 }
  0x48   :  { %10882 = dma.done.wait [#allocation9], 2048  }
  0x49   :  { %10883 = vsyncadd [#allocation9], 4294965248  ;;  %v10892_v0 = vmov 0.0|0.0   ;;  %vm10893_vm0 = vmmov 0   ;;  %v10894_v1 = vmov 0.0   ;;  %vm77_vm1 = vcmask 130048  }
  0x4a   :  { %9347 = vmatprep.subr.bf16.mxu0 %v10892_v0  ;;  %7431 = vmatprep.mubr.msk.f32.mxu0 %vm10893_vm0, %v10894_v1  ;;  %v75_v2 = vld [vmem:[#allocation5] sm:$0xff]  ;;  %v76_v3 = vld [vmem:[#allocation5 + $0x8] sm:$0xff]  ;;  %v74_v4 = vld [vmem:[#allocation2] sm:$0xff]  ;;  %vm5773_vm2 = vcmask 1040384   ;;  %vm5775_vm3 = vcmask 1041408   ;;  %vm5777_vm4 = vcmask 1042432  }
  0x4b   :  { %9338 = vmatprep.subr.bf16.mxu1 %v10892_v0  ;;  %7410 = vmatprep.mubr.msk.f32.mxu1 %vm10893_vm0, %v10894_v1  ;;  %v82_v5 = vand.u32 4294901760, %v75_v2  ;;  %v85_v6 = vand.u32 4294901760, %v76_v3  ;;  %v79_v7 = vsel %vm77_vm1, %v74_v4, 0  ;;  %v10989_v8 = vld [vmem:[#allocation7] sm:$0xff]  ;;  %v10991_v9 = vld [vmem:[#allocation7 + $0x8] sm:$0xff]  ;;  %v10993_v10 = vld [vmem:[#allocation7 + $0x10] sm:$0xff] }
  0x4c   :  { %v10995_v11 = vand.u32 4294901760, %v79_v7  ;;  %v557_v12 = vand.u32 4294901760, %v10989_v8  ;;  %v560_v13 = vand.u32 4294901760, %v10991_v9  ;;  %v10999_v14 = vld [vmem:[#allocation7 + $0x18] sm:$0xff]  ;;  %v563_v21 = vand.u32 4294901760, %v10993_v10  ;;  %v11025_v26 = vld [vmem:[#allocation7 + $0x20] sm:$0xff] }
  0x4d   :  { %v9339_v15 = vpack.c.bf16 %v85_v6, %v82_v5  ;;  %v11001_v16 = vsub.f32 %v75_v2, %v82_v5  ;;  %v11003_v17 = vsub.f32 %v76_v3, %v85_v6  ;;  %v566_v24 = vand.u32 4294901760, %v10999_v14  ;;  %v11037_v34 = vld [vmem:[#allocation7 + $0x28] sm:$0xff]  ;;  %v11047_v39 = vld [vmem:[#allocation7 + $0x30] sm:$0xff]  ;;  %v11049_v40 = vld [vmem:[#allocation7 + $0x38] sm:$0xff]  ;;  %s10895_s29 = smov [#allocation10]  }
  0x4e   :  { %v11006_v18 = vsub.f32 %v79_v7, %v10995_v11  ;;  %v11011_v19 = vsub.f32 %v10989_v8, %v557_v12  ;;  %v11016_v20 = vsub.f32 %v10991_v9, %v560_v13  ;;  %v11035_v33 = vsub.f32 %v10993_v10, %v563_v21  ;;  %v11056_v45 = vld [vmem:[#allocation7 + $0x40] sm:$0xff]  ;;  %v11088_v55 = vld [vmem:[#allocation7 + $0x48] sm:$0xff]  ;;  %v11091_v57 = vld [vmem:[#allocation7 + $0x50] sm:$0xff]  ;;  %s6458_s17 = sshll.u32 %s10895_s29, 4  ;;  %s6459_s17 = int_to_ptr.vmem [resolvable:$true] %s6458_s17 }
  0x4f   :  { %9349 = vmatpush3.bf16.msra.mxu0 %v9339_v15  ;;  %9340 = vmatpush3.bf16.msra.mxu1 %v9339_v15  ;;  %v161_v22 = vand.u32 4294901760, %v11001_v16  ;;  %v168_v23 = vand.u32 4294901760, %v11003_v17  ;;  %v11044_v37 = vsub.f32 %v10999_v14, %v566_v24  ;;  %v569_v38 = vand.u32 4294901760, %v11025_v26  ;;  %v11099_v62 = vld [vmem:[#allocation7 + $0x58] sm:$0xff]  ;;  %s10856_s1 = scalar_lea.vmem %s6459_s17, 128  ;;  %p10861_p5 = scmp.lt.s32.totalorder %s6459_s17, %s6459_s17 }
  0x50   :  { %v150_v25 = vand.u32 4294901760, %v11006_v18  ;;  %9341 = vmatprep.subr.bf16.mxu1 %v10892_v0  ;;  %9350 = vmatprep.subr.bf16.mxu0 %v10892_v0  ;;  %v645_v30 = vand.u32 4294901760, %v11011_v19  ;;  %v652_v32 = vand.u32 4294901760, %v11016_v20  ;;  %v572_v44 = vand.u32 4294901760, %v11037_v34  ;;  %p10857_p4 = scmp.ne.s32.totalorder %s6459_s17, %s10856_s1  ;;  %p10862_p6 = scmp.lt.s32.totalorder %s10856_s1, %s10856_s1 }
  0x51   :  { %v162_v27 = vsub.f32 %v11001_v16, %v161_v22  ;;  %v169_v28 = vsub.f32 %v11003_v17, %v168_v23  ;;  %v9351_v29 = vpack.c.bf16 %v168_v23, %v161_v22  ;;  %v659_v47 = vand.u32 4294901760, %v11035_v33  ;;  %v11122_v23 = vld [vmem:[#allocation7 + $0x60] sm:$0xff] }
  0x52   :  { %7432 = vmatmul.mubr.f32.vlgmr.msra.gmra.mrb[0].mxu0 %v150_v25  ;;  %v151_v31 = vsub.f32 %v11006_v18, %v150_v25  ;;  %v646_v43 = vsub.f32 %v11011_v19, %v645_v30  ;;  %v653_v46 = vsub.f32 %v11016_v20, %v652_v32  ;;  %v575_v48 = vand.u32 4294901760, %v11047_v39  ;;  %v11124_v25 = vld [vmem:[#allocation7 + $0x68] sm:$0xff]  ;;  %p10863_p7 = por %p10862_p6, %p10861_p5 }
  0x53   :  { %v163_v35 = vand.u32 4294901760, %v162_v27  ;;  %v170_v36 = vand.u32 4294901760, %v169_v28  ;;  %9352 = vmatpush3.bf16.msra.mxu0 %v9351_v29  ;;  %7438 = vmatprep.mubr.msk.f32.mxu0 %vm10893_vm0, %v10894_v1  ;;  %v12589_v49 = vand.u32 4294901760, %v11049_v40  ;;  %v666_v50 = vand.u32 4294901760, %v11044_v37 }
  0x54   :  { %v152_v41 = vand.u32 4294901760, %v151_v31  ;;  %9353 = vmatprep.subr.bf16.mxu0 %v10892_v0  ;;  %v11070_v51 = vsub.f32 %v11025_v26, %v569_v38  ;;  %v11075_v52 = vsub.f32 %v11037_v34, %v572_v44  ;;  %v11081_v53 = vsub.f32 %v11047_v39, %v575_v48  ;;  %p10864_p8 = pnand %p10863_p7, %p10857_p4 }
  0x55   :  { %v9342_v42 = vpack.c.bf16 %v170_v36, %v163_v35  ;;  %v11086_v54 = vsub.f32 %v11049_v40, %v12589_v49  ;;  %v12588_v56 = vand.u32 4294901760, %v11056_v45  ;;  %v9345_v58 = vpack.c.bf16 %v11003_v17, %v11001_v16  ;;  %v11139_v35 = vld [vmem:[#allocation7 + $0x70] sm:$0xff]  ;;  %v11141_v36 = vld [vmem:[#allocation7 + $0x78] sm:$0xff] }
  0x56   :  { %7411 = vmatmul.mubr.f32.vlgmr.msra.gmra.mrb[0].mxu1 %v152_v41  ;;  %v647_v59 = vand.u32 4294901760, %v646_v43  ;;  %v654_v60 = vand.u32 4294901760, %v653_v46  ;;  %v660_v61 = vsub.f32 %v11035_v33, %v659_v47  ;;  %v667_v63 = vsub.f32 %v11044_v37, %v666_v50 }
  0x57   :  { %9343 = vmatpush3.bf16.msra.mxu1 %v9342_v42  ;;  %7417 = vmatprep.mubr.msk.f32.mxu1 %vm10893_vm0, %v10894_v1  ;;  %v673_v2 = vand.u32 4294901760, %v11070_v51  ;;  %v680_v3 = vand.u32 4294901760, %v11075_v52  ;;  %v12587_v4 = vand.u32 4294901760, %v11088_v55  ;;  %v687_v5 = vand.u32 4294901760, %v11081_v53 }
  0x58   :  { %9344 = vmatprep.subr.bf16.mxu1 %v10892_v0  ;;  %v694_v6 = vand.u32 4294901760, %v11086_v54  ;;  %v11115_v7 = vsub.f32 %v11056_v45, %v12588_v56  ;;  %v12586_v16 = vand.u32 4294901760, %v11099_v62  ;;  %v11120_v17 = vpack.c.bf16 %v654_v60, %v647_v59 }
  0x59   :  { %v661_v22 = vand.u32 4294901760, %v660_v61  ;;  %v668_v27 = vand.u32 4294901760, %v667_v63  ;;  %v674_v28 = vsub.f32 %v11070_v51, %v673_v2  ;;  %v681_v29 = vsub.f32 %v11075_v52, %v680_v3 }
  0x5a   :  { %7439 = vmatmul.mubr.f32.vlgmr.msra.gmra.mrb[0].mxu0 %v10995_v11  ;;  %v11137_v31 = vsub.f32 %v11088_v55, %v12587_v4  ;;  %v688_v41 = vsub.f32 %v11081_v53, %v687_v5  ;;  %v695_v42 = vsub.f32 %v11086_v54, %v694_v6  ;;  %v701_v43 = vand.u32 4294901760, %v11115_v7 }
  0x5b   :  { %9355 = vmatpush3.bf16.msra.mxu0 %v9339_v15  ;;  %7445 = vmatprep.mubr.msk.f32.mxu0 %vm10893_vm0, %v10894_v1  ;;  %v12585_v15 = vand.u32 4294901760, %v11091_v57  ;;  %v593_v59 = vand.u32 4294901760, %v11122_v23  ;;  %v596_v60 = vand.u32 4294901760, %v11124_v25  ;;  %v11168_v61 = vpack.c.bf16 %v560_v13, %v557_v12 }
  0x5c   :  { %9380 = vmatprep.subr.bf16.mxu0 %v10892_v0  ;;  %v599_v63 = vand.u32 4294901760, %v11139_v35  ;;  %v675_v4 = vand.u32 4294901760, %v674_v28  ;;  %v682_v56 = vand.u32 4294901760, %v681_v29  ;;  %v708_v49 = vand.u32 4294901760, %v11137_v31 }
  0x5d   :  { %v11154_v46 = vsub.f32 %v11091_v57, %v12585_v15  ;;  %v12590_v15 = vand.u32 4294901760, %v11141_v36  ;;  %v689_v8 = vand.u32 4294901760, %v688_v41  ;;  %v696_v9 = vand.u32 4294901760, %v695_v42 }
  0x5e   :  { %7418 = vmatmul.mubr.f32.vlgmr.msra.gmra.mrb[0].mxu1 %v10995_v11  ;;  %v11196_v28 = vsub.f32 %v11139_v35, %v599_v63  ;;  %v11208_v41 = vpack.c.bf16 %v566_v24, %v563_v21  ;;  %v709_v42 = vsub.f32 %v11137_v31, %v708_v49  ;;  %v11234_v26 = vpack.c.bf16 %v652_v32, %v645_v30 }
  0x5f   :  { %9346 = vmatpush3.bf16.msra.mxu1 %v9345_v58  ;;  %7424 = vmatprep.mubr.msk.f32.mxu1 %vm10893_vm0, %v10894_v1  ;;  %v11159_v58 = vsub.f32 %v11099_v62, %v12586_v16  ;;  %v11173_v16 = vpack.c.bf16 %v668_v27, %v661_v22  ;;  %v715_v12 = vand.u32 4294901760, %v11154_v46  ;;  %v11185_v22 = vsub.f32 %v11122_v23, %v593_v59 }
  0x60   :  { %9356 = vmatprep.subr.bf16.mxu1 %v10892_v0  ;;  %v11190_v27 = vsub.f32 %v11124_v25, %v596_v60  ;;  %v11201_v29 = vsub.f32 %v11141_v36, %v12590_v15  ;;  %v11219_v15 = vpack.c.bf16 %v572_v44, %v569_v38  ;;  %v11222_v10 = vpack.c.bf16 %v696_v9, %v689_v8 }
  0x61   :  { %v722_v13 = vand.u32 4294901760, %v11159_v58  ;;  %v716_v21 = vsub.f32 %v11154_v46, %v715_v12  ;;  %v743_v34 = vand.u32 4294901760, %v11196_v28  ;;  %v11242_v44 = vpack.c.bf16 %v666_v50, %v659_v47 }
  0x62   :  { %7446 = vmatmul.mubr.f32.vlgmr.msra.gmra.mrb[0].mxu0 %v10995_v11  ;;  %v702_v11 = vsub.f32 %v11115_v7, %v701_v43  ;;  %v750_v38 = vand.u32 4294901760, %v11201_v29  ;;  %v11248_v8 = vpack.c.bf16 %v680_v3, %v673_v2  ;;  %v710_v30 = vand.u32 4294901760, %v709_v42 }
  0x63   :  { %9382 = vmatpush3.bf16.msra.mxu0 %v11120_v17  ;;  %7515 = vmatprep.mubr.msk.f32.mxu0 %vm10893_vm0, %v10894_v1  ;;  %v723_v24 = vsub.f32 %v11159_v58, %v722_v13  ;;  %v11256_v32 = vpack.c.bf16 %v694_v6, %v687_v5  ;;  %v11258_v9 = vpack.c.bf16 %v708_v49, %v701_v43  ;;  %v12602_v3 = vand.u32 4294901760, %v11049_v40 }
  0x64   :  { %9383 = vmatprep.subr.bf16.mxu0 %v10892_v0  ;;  %v703_v14 = vand.u32 4294901760, %v702_v11  ;;  %v11260_v47 = vpack.c.bf16 %v722_v13, %v715_v12  ;;  %v11266_v2 = vpack.c.bf16 %v750_v38, %v743_v34  ;;  %v717_v6 = vand.u32 4294901760, %v716_v21 }
  0x65   :  { %v11272_v11 = vpack.c.bf16 %v12602_v3, %v575_v48  ;;  %v724_v43 = vand.u32 4294901760, %v723_v24  ;;  %v12603_v39 = vand.u32 4294901760, %v11056_v45  ;;  %v12604_v40 = vand.u32 4294901760, %v11088_v55 }
  0x66   :  { %7425 = vmatmul.mubr.f32.vlgmr.msra.gmra.mrb[0].mxu1 %v11006_v18  ;;  %v11211_v18 = vpack.c.bf16 %v682_v56, %v675_v4  ;;  %v729_v56 = vand.u32 4294901760, %v11185_v22  ;;  %v736_v4 = vand.u32 4294901760, %v11190_v27  ;;  %v11277_v49 = vpack.c.bf16 %v710_v30, %v703_v14 }
  0x67   :  { %9358 = vmatpush3.bf16.msra.mxu1 %v11168_v61  ;;  %9385 = vmatpush3.bf16.msra.mxu0 %v11173_v16  ;;  %v11286_v48 = vpack.c.bf16 %v12604_v40, %v12603_v39  ;;  %v11290_v42 = vpack.c.bf16 %v724_v43, %v717_v6  ;;  %v744_v21 = vsub.f32 %v11196_v28, %v743_v34  ;;  %v12605_v45 = vand.u32 4294901760, %v11091_v57 }
  0x68   :  { %9359 = vmatprep.subr.bf16.mxu1 %v10892_v0  ;;  %9386 = vmatprep.subr.bf16.mxu0 %v10892_v0  ;;  %v11264_v50 = vpack.c.bf16 %v736_v4, %v729_v56  ;;  %v730_v5 = vsub.f32 %v11185_v22, %v729_v56  ;;  %v737_v12 = vsub.f32 %v11190_v27, %v736_v4  ;;  %v12606_v55 = vand.u32 4294901760, %v11099_v62 }
  0x69   :  { %7480 = vmatprep.mubr.msk.f32.mxu1 %vm10893_vm0, %v10894_v1  ;;  %v751_v24 = vsub.f32 %v11201_v29, %v750_v38  ;;  %v745_v30 = vand.u32 4294901760, %v744_v21  ;;  %v11313_v57 = vpack.c.bf16 %v596_v60, %v593_v59  ;;  %v12607_v38 = vand.u32 4294901760, %v11141_v36 }
  0x6a   :  { %v731_v13 = vand.u32 4294901760, %v730_v5  ;;  %v738_v14 = vand.u32 4294901760, %v737_v12  ;;  %v11301_v56 = vpack.c.bf16 %v12606_v55, %v12605_v45  ;;  %v11334_v23 = vpack.c.bf16 %v11016_v20, %v11011_v19 }
  0x6b   :  { %9361 = vmatpush3.bf16.msra.mxu1 %v11208_v41  ;;  %9388 = vmatpush3.bf16.msra.mxu0 %v11211_v18  ;;  %v752_v34 = vand.u32 4294901760, %v751_v24  ;;  %v11325_v3 = vpack.c.bf16 %v12607_v38, %v599_v63  ;;  %v11345_v25 = vpack.c.bf16 %v11044_v37, %v11035_v33  ;;  %v11355_v19 = vpack.c.bf16 %v11075_v52, %v11070_v51 }
  0x6c   :  { %9362 = vmatprep.subr.bf16.mxu1 %v10892_v0  ;;  %9389 = vmatprep.subr.bf16.mxu0 %v10892_v0  ;;  %v11304_v4 = vpack.c.bf16 %v738_v14, %v731_v13  ;;  %v11363_v20 = vpack.c.bf16 %v11086_v54, %v11081_v53  ;;  %v11371_v33 = vpack.c.bf16 %v11137_v31, %v11115_v7  ;;  %vm5779_vm5 = vcmask 1043456  }
  0x6d   :  { %v11316_v62 = vpack.c.bf16 %v752_v34, %v745_v30  ;;  %v11379_v37 = vpack.c.bf16 %v11159_v58, %v11154_v46  ;;  %v11387_v51 = vpack.c.bf16 %v11190_v27, %v11185_v22  ;;  %v11395_v52 = vpack.c.bf16 %v11201_v29, %v11196_v28 }
  0x6e   :  { %vm5781_vm6 = vcmask 1044480   ;;  %vm5783_vm7 = vcmask 1045504   ;;  %vm5785_vm8 = vcmask 1046528  }
  0x6f   :  { %9364 = vmatpush3.bf16.msra.mxu1 %v11219_v15  ;;  %9391 = vmatpush3.bf16.msra.mxu0 %v11222_v10 }
  0x70   :  { %9365 = vmatprep.subr.bf16.mxu1 %v10892_v0  ;;  %9392 = vmatprep.subr.bf16.mxu0 %v10892_v0 }
  0x73   :  { %9367 = vmatpush3.bf16.msra.mxu1 %v11272_v11  ;;  %9394 = vmatpush3.bf16.msra.mxu0 %v11277_v49 }
  0x74   :  { %9368 = vmatprep.subr.bf16.mxu1 %v10892_v0  ;;  %9395 = vmatprep.subr.bf16.mxu0 %v10892_v0 }
  0x77   :  { %9370 = vmatpush3.bf16.msra.mxu1 %v11286_v48  ;;  %9397 = vmatpush3.bf16.msra.mxu0 %v11290_v42 }
  0x78   :  { %9371 = vmatprep.subr.bf16.mxu1 %v10892_v0  ;;  %9398 = vmatprep.subr.bf16.mxu0 %v10892_v0 }
  0x7b   :  { %9373 = vmatpush3.bf16.msra.mxu1 %v11301_v56  ;;  %9400 = vmatpush3.bf16.msra.mxu0 %v11304_v4 }
  0x7c   :  { %9374 = vmatprep.subr.bf16.mxu1 %v10892_v0  ;;  %9401 = vmatprep.subr.bf16.mxu0 %v10892_v0 }
  0x7f   :  { %9376 = vmatpush3.bf16.msra.mxu1 %v11313_v57  ;;  %9403 = vmatpush3.bf16.msra.mxu0 %v11316_v62 }
  0x80   :  { %9377 = vmatprep.subr.bf16.mxu1 %v10892_v0  ;;  %9428 = vmatprep.subr.bf16.mxu0 %v10892_v0 }
  0x82   :  { %7516 = vmatmul.mubr.f32.vlgmr.msra.gmra.mrb[2].mxu0 %v10894_v1 }
  0x83   :  { %9379 = vmatpush3.bf16.msra.mxu1 %v11325_v3  ;;  %9430 = vmatpush3.bf16.msra.mxu0 %v11168_v61 }
  0x84   :  { %9404 = vmatprep.subr.bf16.mxu1 %v10892_v0  ;;  %9431 = vmatprep.subr.bf16.mxu0 %v10892_v0 }
  0x85   :  { %7585 = vmatprep.mubr.msk.f32.mxu0 %vm10893_vm0, %v10894_v1 }
  0x86   :  { %7481 = vmatmul.mubr.f32.vlgmr.msra.gmra.mrb[2].mxu1 %v10894_v1 }
  0x87   :  { %9406 = vmatpush3.bf16.msra.mxu1 %v11334_v23  ;;  %9433 = vmatpush3.bf16.msra.mxu0 %v11208_v41 }
  0x88   :  { %9407 = vmatprep.subr.bf16.mxu1 %v10892_v0  ;;  %9434 = vmatprep.subr.bf16.mxu0 %v10892_v0 }
  0x89   :  { %7550 = vmatprep.mubr.msk.f32.mxu1 %vm10893_vm0, %v10894_v1 }
  0x8b   :  { %9409 = vmatpush3.bf16.msra.mxu1 %v11345_v25  ;;  %9436 = vmatpush3.bf16.msra.mxu0 %v11219_v15 }
  0x8c   :  { %9410 = vmatprep.subr.bf16.mxu1 %v10892_v0  ;;  %9437 = vmatprep.subr.bf16.mxu0 %v10892_v0 }
  0x8f   :  { %9412 = vmatpush3.bf16.msra.mxu1 %v11355_v19  ;;  %9439 = vmatpush3.bf16.msra.mxu0 %v11272_v11 }
  0x90   :  { %9413 = vmatprep.subr.bf16.mxu1 %v10892_v0  ;;  %9440 = vmatprep.subr.bf16.mxu0 %v10892_v0 }
  0x93   :  { %9415 = vmatpush3.bf16.msra.mxu1 %v11363_v20  ;;  %9442 = vmatpush3.bf16.msra.mxu0 %v11286_v48 }
  0x94   :  { %9416 = vmatprep.subr.bf16.mxu1 %v10892_v0  ;;  %9443 = vmatprep.subr.bf16.mxu0 %v10892_v0 }
  0x97   :  { %9418 = vmatpush3.bf16.msra.mxu1 %v11371_v33  ;;  %9445 = vmatpush3.bf16.msra.mxu0 %v11301_v56 }
  0x98   :  { %9419 = vmatprep.subr.bf16.mxu1 %v10892_v0  ;;  %9446 = vmatprep.subr.bf16.mxu0 %v10892_v0 }
  0x9b   :  { %9421 = vmatpush3.bf16.msra.mxu1 %v11379_v37  ;;  %9448 = vmatpush3.bf16.msra.mxu0 %v11313_v57 }
  0x9c   :  { %9422 = vmatprep.subr.bf16.mxu1 %v10892_v0  ;;  %9449 = vmatprep.subr.bf16.mxu0 %v10892_v0 }
  0x9f   :  { %9424 = vmatpush3.bf16.msra.mxu1 %v11387_v51  ;;  %9451 = vmatpush3.bf16.msra.mxu0 %v11325_v3 }
  0xa0   :  { %9425 = vmatprep.subr.bf16.mxu1 %v10892_v0  ;;  %9476 = vmatprep.subr.bf16.mxu0 %v10892_v0 }
  0xa2   :  { %7586 = vmatmul.mubr.f32.vlgmr.msra.gmra.mrb[4].mxu0 %v10894_v1 }
  0xa3   :  { %9427 = vmatpush3.bf16.msra.mxu1 %v11395_v52  ;;  %9478 = vmatpush3.bf16.msra.mxu0 %v11168_v61 }
  0xa4   :  { %9452 = vmatprep.subr.bf16.mxu1 %v10892_v0  ;;  %9479 = vmatprep.subr.bf16.mxu0 %v10892_v0 }
  0xa5   :  { %7655 = vmatprep.mubr.msk.f32.mxu0 %vm10893_vm0, %v10894_v1 }
  0xa6   :  { %7551 = vmatmul.mubr.f32.vlgmr.msra.gmra.mrb[4].mxu1 %v10894_v1 }
  0xa7   :  { %9454 = vmatpush3.bf16.msra.mxu1 %v11234_v26  ;;  %9481 = vmatpush3.bf16.msra.mxu0 %v11208_v41 }
  0xa8   :  { %9455 = vmatprep.subr.bf16.mxu1 %v10892_v0  ;;  %9482 = vmatprep.subr.bf16.mxu0 %v10892_v0 }
  0xa9   :  { %7620 = vmatprep.mubr.msk.f32.mxu1 %vm10893_vm0, %v10894_v1 }
  0xab   :  { %9457 = vmatpush3.bf16.msra.mxu1 %v11242_v44  ;;  %9484 = vmatpush3.bf16.msra.mxu0 %v11219_v15 }
  0xac   :  { %9458 = vmatprep.subr.bf16.mxu1 %v10892_v0  ;;  %9485 = vmatprep.subr.bf16.mxu0 %v10892_v0 }
  0xaf   :  { %9460 = vmatpush3.bf16.msra.mxu1 %v11248_v8  ;;  %9487 = vmatpush3.bf16.msra.mxu0 %v11272_v11 }
  0xb0   :  { %9461 = vmatprep.subr.bf16.mxu1 %v10892_v0  ;;  %9488 = vmatprep.subr.bf16.mxu0 %v10892_v0 }
  0xb3   :  { %9463 = vmatpush3.bf16.msra.mxu1 %v11256_v32  ;;  %9490 = vmatpush3.bf16.msra.mxu0 %v11286_v48 }
  0xb4   :  { %9464 = vmatprep.subr.bf16.mxu1 %v10892_v0  ;;  %9491 = vmatprep.subr.bf16.mxu0 %v10892_v0 }
  0xb7   :  { %9466 = vmatpush3.bf16.msra.mxu1 %v11258_v9  ;;  %9493 = vmatpush3.bf16.msra.mxu0 %v11301_v56 }
  0xb8   :  { %9467 = vmatprep.subr.bf16.mxu1 %v10892_v0  ;;  %9494 = vmatprep.subr.bf16.mxu0 %v10892_v0 }
  0xbb   :  { %9469 = vmatpush3.bf16.msra.mxu1 %v11260_v47  ;;  %9496 = vmatpush3.bf16.msra.mxu0 %v11313_v57 }
  0xbc   :  { %9470 = vmatprep.subr.bf16.mxu1 %v10892_v0  ;;  %9497 = vmatprep.subr.bf16.mxu0 %v10892_v0 }
  0xbf   :  { %9472 = vmatpush3.bf16.msra.mxu1 %v11264_v50  ;;  %9499 = vmatpush3.bf16.msra.mxu0 %v11325_v3 }
  0xc0   :  { %9473 = vmatprep.subr.bf16.mxu1 %v10892_v0  ;;  %9644 = vmatprep.subr.bf16.mxu0 %v10892_v0 }
  0xc2   :  { %7656 = vmatmul.mubr.f32.vlgmr.msra.gmra.mrb[6].mxu0 %v10894_v1 }
  0xc3   :  { %9475 = vmatpush3.bf16.msra.mxu1 %v11266_v2  ;;  %9646 = vmatpush3.bf16.msra.mxu0 %v11168_v61 }
  0xc4   :  { %9500 = vmatprep.subr.bf16.mxu1 %v10892_v0  ;;  %9647 = vmatprep.subr.bf16.mxu0 %v10892_v0 }
  0xc5   :  { %7900 = vmatprep.mubr.msk.f32.mxu0 %vm10893_vm0, %v10894_v1 }
  0xc6   :  { %7621 = vmatmul.mubr.f32.vlgmr.msra.gmra.mrb[6].mxu1 %v10894_v1 }
  0xc7   :  { %9502 = vmatpush3.bf16.msra.mxu1 %v11168_v61  ;;  %7690 = vmatprep.mubr.msk.f32.mxu1 %vm10893_vm0, %v10894_v1 }
  0xc8   :  { %9503 = vmatprep.subr.bf16.mxu1 %v10892_v0  ;;  %9649 = vmatpush3.bf16.msra.mxu0 %v11208_v41 }
  0xc9   :  { %9650 = vmatprep.subr.bf16.mxu0 %v10892_v0 }
  0xcb   :  { %9505 = vmatpush3.bf16.msra.mxu1 %v11208_v41 }
  0xcc   :  { %9506 = vmatprep.subr.bf16.mxu1 %v10892_v0  ;;  %9652 = vmatpush3.bf16.msra.mxu0 %v11219_v15 }
  0xcd   :  { %9653 = vmatprep.subr.bf16.mxu0 %v10892_v0 }
  0xcf   :  { %9508 = vmatpush3.bf16.msra.mxu1 %v11219_v15 }
  0xd0   :  { %9509 = vmatprep.subr.bf16.mxu1 %v10892_v0  ;;  %9655 = vmatpush3.bf16.msra.mxu0 %v11272_v11 }
  0xd1   :  { %9656 = vmatprep.subr.bf16.mxu0 %v10892_v0 }
  0xd3   :  { %9511 = vmatpush3.bf16.msra.mxu1 %v11272_v11 }
  0xd4   :  { %9512 = vmatprep.subr.bf16.mxu1 %v10892_v0  ;;  %9658 = vmatpush3.bf16.msra.mxu0 %v11286_v48 }
  0xd5   :  { %9659 = vmatprep.subr.bf16.mxu0 %v10892_v0 }
  0xd7   :  { %9514 = vmatpush3.bf16.msra.mxu1 %v11286_v48 }
  0xd8   :  { %9515 = vmatprep.subr.bf16.mxu1 %v10892_v0  ;;  %9661 = vmatpush3.bf16.msra.mxu0 %v11301_v56 }
  0xd9   :  { %9662 = vmatprep.subr.bf16.mxu0 %v10892_v0 }
  0xdb   :  { %9517 = vmatpush3.bf16.msra.mxu1 %v11301_v56 }
  0xdc   :  { %9518 = vmatprep.subr.bf16.mxu1 %v10892_v0  ;;  %9664 = vmatpush3.bf16.msra.mxu0 %v11313_v57 }
  0xdd   :  { %9665 = vmatprep.subr.bf16.mxu0 %v10892_v0 }
  0xdf   :  { %9520 = vmatpush3.bf16.msra.mxu1 %v11313_v57 }
  0xe0   :  { %9521 = vmatprep.subr.bf16.mxu1 %v10892_v0  ;;  %9667 = vmatpush3.bf16.msra.mxu0 %v11325_v3 }
  0xe1   :  { %9668 = vmatprep.subr.bf16.mxu0 %v10892_v0 }
  0xe3   :  { %9523 = vmatpush3.bf16.msra.mxu1 %v11325_v3 }
  0xe4   :  { %9524 = vmatprep.subr.bf16.mxu1 %v10892_v0 }
 0x135   :  { %v536_v53 = vpop.f32.mrb[0].mxu0 }
 0x136   :  { %v7447_v54 = vpop.f32.mrb[1].mxu0 }
 0x139   :  { %v311_v7 = vpop.f32.mrb[0].mxu1 }
 0x13a   :  { %v11478_v31 = vadd.f32 %v536_v53, %v311_v7  ;;  %v7426_v35 = vpop.f32.mrb[1].mxu1 }
 0x155   :  { %v788_v36 = vpop.f32.mrb[2].mxu0 }
 0x156   :  { %v7517_v46 = vpop.f32.mrb[3].mxu0 }
 0x159   :  { %v638_v58 = vpop.f32.mrb[2].mxu1 }
 0x15a   :  { %v7482_v59 = vpop.f32.mrb[3].mxu1  ;;  %v789_v60 = vadd.f32 %v788_v36, %v638_v58 }
 0x175   :  { %v976_v63 = vpop.f32.mrb[4].mxu0 }
 0x176   :  { %v7587_v22 = vpop.f32.mrb[5].mxu0 }
 0x179   :  { %v890_v27 = vpop.f32.mrb[4].mxu1 }
 0x17a   :  { %v891_v28 = vadd.f32 %v890_v27, %v789_v60  ;;  %v7552_v29 = vpop.f32.mrb[5].mxu1 }
 0x17c   :  { %v977_v5 = vadd.f32 %v976_v63, %v891_v28 }
 0x195   :  { %v1180_v6 = vpop.f32.mrb[6].mxu0 }
 0x196   :  { %v7657_v43 = vpop.f32.mrb[7].mxu0 }
 0x199   :  { %v1094_v12 = vpop.f32.mrb[6].mxu1 }
 0x19a   :  { %v1095_v39 = vadd.f32 %v1094_v12, %v977_v5  ;;  %v7622_v40 = vpop.f32.mrb[7].mxu1 }
 0x19c   :  { %v1181_v13 = vadd.f32 %v1180_v6, %v1095_v39 }
 0x19e   :  { %v1184_v14 = vadd.f32 %v11478_v31, %v1181_v13 }
 0x1a0   :  { %10752 = vtanh.f32 %v1184_v14 }
 0x1aa   :  { %v10753_v21 = vpop.eup %10752 }
 0x1ab   :  { %v11481_v24 = vmul.f32 0.3, %v10753_v21 }
 0x1ad   :  { %v11484_v45 = vand.u32 4294901760, %v11481_v24  ;;  %v1834_v58 = vmul.f32 0.7, %v11481_v24 }
 0x1af   :  { %v1270_v55 = vsub.f32 %v11481_v24, %v11484_v45 }
 0x1b1   :  { %v1271_v30 = vand.u32 4294901760, %v1270_v55 }
 0x1b3   :  { %v1272_v34 = vsub.f32 %v1270_v55, %v1271_v30 }
 0x1b5   :  { %v1273_v38 = vand.u32 4294901760, %v1272_v34 }
 0x1b7   :  { %7691 = vmatmul.mubr.f32.vlgmr.msra.gmra.mrb[8].mxu1 %v1273_v38 }
 0x1b8   :  { %9526 = vmatpush3.bf16.msra.mxu1 %v11120_v17  ;;  %7725 = vmatprep.mubr.msk.f32.mxu1 %vm10893_vm0, %v10894_v1 }
 0x1b9   :  { %9527 = vmatprep.subr.bf16.mxu1 %v10892_v0 }
 0x1bc   :  { %9529 = vmatpush3.bf16.msra.mxu1 %v11173_v16 }
 0x1bd   :  { %9530 = vmatprep.subr.bf16.mxu1 %v10892_v0 }
 0x1c0   :  { %9532 = vmatpush3.bf16.msra.mxu1 %v11211_v18 }
 0x1c1   :  { %9533 = vmatprep.subr.bf16.mxu1 %v10892_v0 }
 0x1c4   :  { %9535 = vmatpush3.bf16.msra.mxu1 %v11222_v10 }
 0x1c5   :  { %9536 = vmatprep.subr.bf16.mxu1 %v10892_v0 }
 0x1c8   :  { %9538 = vmatpush3.bf16.msra.mxu1 %v11277_v49 }
 0x1c9   :  { %9539 = vmatprep.subr.bf16.mxu1 %v10892_v0 }
 0x1cc   :  { %9541 = vmatpush3.bf16.msra.mxu1 %v11290_v42 }
 0x1cd   :  { %9542 = vmatprep.subr.bf16.mxu1 %v10892_v0 }
 0x1d0   :  { %9544 = vmatpush3.bf16.msra.mxu1 %v11304_v4 }
 0x1d1   :  { %9545 = vmatprep.subr.bf16.mxu1 %v10892_v0 }
 0x1d4   :  { %9547 = vmatpush3.bf16.msra.mxu1 %v11316_v62 }
 0x1d5   :  { %9548 = vmatprep.subr.bf16.mxu1 %v10892_v0 }
 0x1d7   :  { %7726 = vmatmul.mubr.f32.vlgmr.msra.gmra.mrb[8].mxu1 %v11484_v45 }
 0x1d8   :  { %9550 = vmatpush3.bf16.msra.mxu1 %v11334_v23  ;;  %7760 = vmatprep.mubr.msk.f32.mxu1 %vm10893_vm0, %v10894_v1 }
 0x1d9   :  { %9551 = vmatprep.subr.bf16.mxu1 %v10892_v0 }
 0x1dc   :  { %9553 = vmatpush3.bf16.msra.mxu1 %v11345_v25 }
 0x1dd   :  { %9554 = vmatprep.subr.bf16.mxu1 %v10892_v0 }
 0x1e0   :  { %9556 = vmatpush3.bf16.msra.mxu1 %v11355_v19 }
 0x1e1   :  { %9557 = vmatprep.subr.bf16.mxu1 %v10892_v0 }
 0x1e4   :  { %9559 = vmatpush3.bf16.msra.mxu1 %v11363_v20 }
 0x1e5   :  { %9560 = vmatprep.subr.bf16.mxu1 %v10892_v0 }
 0x1e8   :  { %9562 = vmatpush3.bf16.msra.mxu1 %v11371_v33 }
 0x1e9   :  { %9563 = vmatprep.subr.bf16.mxu1 %v10892_v0 }
 0x1ec   :  { %9565 = vmatpush3.bf16.msra.mxu1 %v11379_v37 }
 0x1ed   :  { %9566 = vmatprep.subr.bf16.mxu1 %v10892_v0 }
 0x1f0   :  { %9568 = vmatpush3.bf16.msra.mxu1 %v11387_v51 }
 0x1f1   :  { %9569 = vmatprep.subr.bf16.mxu1 %v10892_v0 }
 0x1f4   :  { %9571 = vmatpush3.bf16.msra.mxu1 %v11395_v52 }
 0x1f5   :  { %9572 = vmatprep.subr.bf16.mxu1 %v10892_v0 }
 0x1f7   :  { %7761 = vmatmul.mubr.f32.vlgmr.msra.gmra.mrb[8].mxu1 %v1270_v55 }
 0x1f8   :  { %9574 = vmatpush3.bf16.msra.mxu1 %v11168_v61  ;;  %7795 = vmatprep.mubr.msk.f32.mxu1 %vm10893_vm0, %v10894_v1 }
 0x1f9   :  { %9575 = vmatprep.subr.bf16.mxu1 %v10892_v0 }
 0x1fc   :  { %9577 = vmatpush3.bf16.msra.mxu1 %v11208_v41 }
 0x1fd   :  { %9578 = vmatprep.subr.bf16.mxu1 %v10892_v0 }
 0x200   :  { %9580 = vmatpush3.bf16.msra.mxu1 %v11219_v15 }
 0x201   :  { %9581 = vmatprep.subr.bf16.mxu1 %v10892_v0 }
 0x204   :  { %9583 = vmatpush3.bf16.msra.mxu1 %v11272_v11 }
 0x205   :  { %9584 = vmatprep.subr.bf16.mxu1 %v10892_v0 }
 0x208   :  { %9586 = vmatpush3.bf16.msra.mxu1 %v11286_v48 }
 0x209   :  { %9587 = vmatprep.subr.bf16.mxu1 %v10892_v0 }
 0x20c   :  { %9589 = vmatpush3.bf16.msra.mxu1 %v11301_v56 }
 0x20d   :  { %9590 = vmatprep.subr.bf16.mxu1 %v10892_v0 }
 0x210   :  { %9592 = vmatpush3.bf16.msra.mxu1 %v11313_v57 }
 0x211   :  { %9593 = vmatprep.subr.bf16.mxu1 %v10892_v0 }
 0x214   :  { %9595 = vmatpush3.bf16.msra.mxu1 %v11325_v3 }
 0x215   :  { %9596 = vmatprep.subr.bf16.mxu1 %v10892_v0 }
 0x217   :  { %7796 = vmatmul.mubr.f32.vlgmr.msra.gmra.mrb[8].mxu1 %v1271_v30 }
 0x218   :  { %9598 = vmatpush3.bf16.msra.mxu1 %v11234_v26  ;;  %7830 = vmatprep.mubr.msk.f32.mxu1 %vm10893_vm0, %v10894_v1 }
 0x219   :  { %9599 = vmatprep.subr.bf16.mxu1 %v10892_v0 }
 0x21c   :  { %9601 = vmatpush3.bf16.msra.mxu1 %v11242_v44 }
 0x21d   :  { %9602 = vmatprep.subr.bf16.mxu1 %v10892_v0 }
 0x220   :  { %9604 = vmatpush3.bf16.msra.mxu1 %v11248_v8 }
 0x221   :  { %9605 = vmatprep.subr.bf16.mxu1 %v10892_v0 }
 0x224   :  { %9607 = vmatpush3.bf16.msra.mxu1 %v11256_v32 }
 0x225   :  { %9608 = vmatprep.subr.bf16.mxu1 %v10892_v0 }
 0x228   :  { %9610 = vmatpush3.bf16.msra.mxu1 %v11258_v9 }
 0x229   :  { %9611 = vmatprep.subr.bf16.mxu1 %v10892_v0 }
 0x22c   :  { %9613 = vmatpush3.bf16.msra.mxu1 %v11260_v47 }
 0x22d   :  { %9614 = vmatprep.subr.bf16.mxu1 %v10892_v0 }
 0x230   :  { %9616 = vmatpush3.bf16.msra.mxu1 %v11264_v50 }
 0x231   :  { %9617 = vmatprep.subr.bf16.mxu1 %v10892_v0 }
 0x234   :  { %9619 = vmatpush3.bf16.msra.mxu1 %v11266_v2 }
 0x235   :  { %9620 = vmatprep.subr.bf16.mxu1 %v10892_v0 }
 0x237   :  { %7831 = vmatmul.mubr.f32.vlgmr.msra.gmra.mrb[8].mxu1 %v11484_v45 }
 0x238   :  { %9622 = vmatpush3.bf16.msra.mxu1 %v11168_v61  ;;  %7865 = vmatprep.mubr.msk.f32.mxu1 %vm10893_vm0, %v10894_v1 }
 0x239   :  { %9623 = vmatprep.subr.bf16.mxu1 %v10892_v0 }
 0x23c   :  { %9625 = vmatpush3.bf16.msra.mxu1 %v11208_v41 }
 0x23d   :  { %9626 = vmatprep.subr.bf16.mxu1 %v10892_v0 }
 0x240   :  { %9628 = vmatpush3.bf16.msra.mxu1 %v11219_v15 }
 0x241   :  { %9629 = vmatprep.subr.bf16.mxu1 %v10892_v0 }
 0x244   :  { %9631 = vmatpush3.bf16.msra.mxu1 %v11272_v11 }
 0x245   :  { %9632 = vmatprep.subr.bf16.mxu1 %v10892_v0 }
 0x248   :  { %9634 = vmatpush3.bf16.msra.mxu1 %v11286_v48 }
 0x249   :  { %9635 = vmatprep.subr.bf16.mxu1 %v10892_v0 }
 0x24c   :  { %9637 = vmatpush3.bf16.msra.mxu1 %v11301_v56 }
 0x24d   :  { %9638 = vmatprep.subr.bf16.mxu1 %v10892_v0 }
 0x250   :  { %9640 = vmatpush3.bf16.msra.mxu1 %v11313_v57 }
 0x251   :  { %9641 = vmatprep.subr.bf16.mxu1 %v10892_v0 }
 0x254   :  { %9643 = vmatpush3.bf16.msra.mxu1 %v11325_v3 }
 0x255   :  { %9788 = vmatprep.subr.bf16.mxu1 %v10892_v0 }
 0x257   :  { %7866 = vmatmul.mubr.f32.vlgmr.msra.gmra.mrb[8].mxu1 %v11484_v45 }
 0x258   :  { %9790 = vmatpush3.bf16.msra.mxu1 %v11168_v61  ;;  %8110 = vmatprep.mubr.msk.f32.mxu1 %vm10893_vm0, %v10894_v1 }
 0x259   :  { %9791 = vmatprep.subr.bf16.mxu1 %v10892_v0 }
 0x25c   :  { %9793 = vmatpush3.bf16.msra.mxu1 %v11208_v41 }
 0x25d   :  { %9794 = vmatprep.subr.bf16.mxu1 %v10892_v0 }
 0x260   :  { %9796 = vmatpush3.bf16.msra.mxu1 %v11219_v15 }
 0x261   :  { %9797 = vmatprep.subr.bf16.mxu1 %v10892_v0 }
 0x264   :  { %9799 = vmatpush3.bf16.msra.mxu1 %v11272_v11 }
 0x265   :  { %9800 = vmatprep.subr.bf16.mxu1 %v10892_v0 }
 0x268   :  { %9802 = vmatpush3.bf16.msra.mxu1 %v11286_v48 }
 0x269   :  { %9803 = vmatprep.subr.bf16.mxu1 %v10892_v0 }
 0x26c   :  { %9805 = vmatpush3.bf16.msra.mxu1 %v11301_v56 }
 0x26d   :  { %9806 = vmatprep.subr.bf16.mxu1 %v10892_v0 }
 0x270   :  { %9808 = vmatpush3.bf16.msra.mxu1 %v11313_v57 }
 0x271   :  { %9809 = vmatprep.subr.bf16.mxu1 %v10892_v0 }
 0x274   :  { %9811 = vmatpush3.bf16.msra.mxu1 %v11325_v3 }
 0x275   :  { %9812 = vmatprep.subr.bf16.mxu1 %v10892_v0 }
 0x32a   :  { %v1825_v53 = vpop.f32.mrb[8].mxu1 }
 0x32b   :  { %v1830_v54 = vrot.slane %v1825_v53, 7  ;;  %v7867_v7 = vpop.f32.mrb[9].mxu1 }
 0x32d   :  { %v1832_v35 = vadd.f32 %v11478_v31, %v1830_v54 }
 0x32f   :  { %10754 = vtanh.f32 %v1832_v35 }
 0x339   :  { %v10755_v36 = vpop.eup %10754 }
 0x33a   :  { %v1835_v46 = vmul.f32 0.3, %v10755_v36 }
 0x33c   :  { %v1837_v59 = vrot.slane %v1835_v46, 1 }
 0x33e   :  { %v11601_v60 = vadd.f32 %v1837_v59, %v1834_v58 }
 0x340   :  { %v11604_v63 = vand.u32 4294901760, %v11601_v60  ;;  %v2486_v13 = vmul.f32 0.7, %v11601_v60  ;;  %v5753_v21 = vrot.slane %v11601_v60, 7 }
 0x342   :  { %v1922_v22 = vsub.f32 %v11601_v60, %v11604_v63  ;;  %v5774_v34 = vsel %vm5773_vm2, %v11481_v24, %v5753_v21 }
 0x344   :  { %v1923_v27 = vand.u32 4294901760, %v1922_v22 }
 0x346   :  { %v1924_v28 = vsub.f32 %v1922_v22, %v1923_v27 }
 0x348   :  { %v1925_v29 = vand.u32 4294901760, %v1924_v28 }
 0x34a   :  { %7901 = vmatmul.mubr.f32.vlgmr.msra.gmra.mrb[8].mxu0 %v1925_v29 }
 0x34b   :  { %9670 = vmatpush3.bf16.msra.mxu0 %v11120_v17  ;;  %7935 = vmatprep.mubr.msk.f32.mxu0 %vm10893_vm0, %v10894_v1 }
 0x34c   :  { %9671 = vmatprep.subr.bf16.mxu0 %v10892_v0 }
 0x34f   :  { %9673 = vmatpush3.bf16.msra.mxu0 %v11173_v16 }
 0x350   :  { %9674 = vmatprep.subr.bf16.mxu0 %v10892_v0 }
 0x353   :  { %9676 = vmatpush3.bf16.msra.mxu0 %v11211_v18 }
 0x354   :  { %9677 = vmatprep.subr.bf16.mxu0 %v10892_v0 }
 0x357   :  { %9679 = vmatpush3.bf16.msra.mxu0 %v11222_v10 }
 0x358   :  { %9680 = vmatprep.subr.bf16.mxu0 %v10892_v0 }
 0x35b   :  { %9682 = vmatpush3.bf16.msra.mxu0 %v11277_v49 }
 0x35c   :  { %9683 = vmatprep.subr.bf16.mxu0 %v10892_v0 }
 0x35f   :  { %9685 = vmatpush3.bf16.msra.mxu0 %v11290_v42 }
 0x360   :  { %9686 = vmatprep.subr.bf16.mxu0 %v10892_v0 }
 0x363   :  { %9688 = vmatpush3.bf16.msra.mxu0 %v11304_v4 }
 0x364   :  { %9689 = vmatprep.subr.bf16.mxu0 %v10892_v0 }
 0x367   :  { %9691 = vmatpush3.bf16.msra.mxu0 %v11316_v62 }
 0x368   :  { %9692 = vmatprep.subr.bf16.mxu0 %v10892_v0 }
 0x36a   :  { %7936 = vmatmul.mubr.f32.vlgmr.msra.gmra.mrb[8].mxu0 %v11604_v63 }
 0x36b   :  { %9694 = vmatpush3.bf16.msra.mxu0 %v11334_v23  ;;  %7970 = vmatprep.mubr.msk.f32.mxu0 %vm10893_vm0, %v10894_v1 }
 0x36c   :  { %9695 = vmatprep.subr.bf16.mxu0 %v10892_v0 }
 0x36f   :  { %9697 = vmatpush3.bf16.msra.mxu0 %v11345_v25 }
 0x370   :  { %9698 = vmatprep.subr.bf16.mxu0 %v10892_v0 }
 0x373   :  { %9700 = vmatpush3.bf16.msra.mxu0 %v11355_v19 }
 0x374   :  { %9701 = vmatprep.subr.bf16.mxu0 %v10892_v0 }
 0x377   :  { %9703 = vmatpush3.bf16.msra.mxu0 %v11363_v20 }
 0x378   :  { %9704 = vmatprep.subr.bf16.mxu0 %v10892_v0 }
 0x37b   :  { %9706 = vmatpush3.bf16.msra.mxu0 %v11371_v33 }
 0x37c   :  { %9707 = vmatprep.subr.bf16.mxu0 %v10892_v0 }
 0x37f   :  { %9709 = vmatpush3.bf16.msra.mxu0 %v11379_v37 }
 0x380   :  { %9710 = vmatprep.subr.bf16.mxu0 %v10892_v0 }
 0x383   :  { %9712 = vmatpush3.bf16.msra.mxu0 %v11387_v51 }
 0x384   :  { %9713 = vmatprep.subr.bf16.mxu0 %v10892_v0 }
 0x387   :  { %9715 = vmatpush3.bf16.msra.mxu0 %v11395_v52 }
 0x388   :  { %9716 = vmatprep.subr.bf16.mxu0 %v10892_v0 }
 0x38a   :  { %7971 = vmatmul.mubr.f32.vlgmr.msra.gmra.mrb[8].mxu0 %v1922_v22 }
 0x38b   :  { %9718 = vmatpush3.bf16.msra.mxu0 %v11168_v61  ;;  %8005 = vmatprep.mubr.msk.f32.mxu0 %vm10893_vm0, %v10894_v1 }
 0x38c   :  { %9719 = vmatprep.subr.bf16.mxu0 %v10892_v0 }
 0x38f   :  { %9721 = vmatpush3.bf16.msra.mxu0 %v11208_v41 }
 0x390   :  { %9722 = vmatprep.subr.bf16.mxu0 %v10892_v0 }
 0x393   :  { %9724 = vmatpush3.bf16.msra.mxu0 %v11219_v15 }
 0x394   :  { %9725 = vmatprep.subr.bf16.mxu0 %v10892_v0 }
 0x397   :  { %9727 = vmatpush3.bf16.msra.mxu0 %v11272_v11 }
 0x398   :  { %9728 = vmatprep.subr.bf16.mxu0 %v10892_v0 }
 0x39b   :  { %9730 = vmatpush3.bf16.msra.mxu0 %v11286_v48 }
 0x39c   :  { %9731 = vmatprep.subr.bf16.mxu0 %v10892_v0 }
 0x39f   :  { %9733 = vmatpush3.bf16.msra.mxu0 %v11301_v56 }
 0x3a0   :  { %9734 = vmatprep.subr.bf16.mxu0 %v10892_v0 }
 0x3a3   :  { %9736 = vmatpush3.bf16.msra.mxu0 %v11313_v57 }
 0x3a4   :  { %9737 = vmatprep.subr.bf16.mxu0 %v10892_v0 }
 0x3a7   :  { %9739 = vmatpush3.bf16.msra.mxu0 %v11325_v3 }
 0x3a8   :  { %9740 = vmatprep.subr.bf16.mxu0 %v10892_v0 }
 0x3aa   :  { %8006 = vmatmul.mubr.f32.vlgmr.msra.gmra.mrb[8].mxu0 %v1923_v27 }
 0x3ab   :  { %9742 = vmatpush3.bf16.msra.mxu0 %v11234_v26  ;;  %8040 = vmatprep.mubr.msk.f32.mxu0 %vm10893_vm0, %v10894_v1 }
 0x3ac   :  { %9743 = vmatprep.subr.bf16.mxu0 %v10892_v0 }
 0x3af   :  { %9745 = vmatpush3.bf16.msra.mxu0 %v11242_v44 }
 0x3b0   :  { %9746 = vmatprep.subr.bf16.mxu0 %v10892_v0 }
 0x3b3   :  { %9748 = vmatpush3.bf16.msra.mxu0 %v11248_v8 }
 0x3b4   :  { %9749 = vmatprep.subr.bf16.mxu0 %v10892_v0 }
 0x3b7   :  { %9751 = vmatpush3.bf16.msra.mxu0 %v11256_v32 }
 0x3b8   :  { %9752 = vmatprep.subr.bf16.mxu0 %v10892_v0 }
 0x3bb   :  { %9754 = vmatpush3.bf16.msra.mxu0 %v11258_v9 }
 0x3bc   :  { %9755 = vmatprep.subr.bf16.mxu0 %v10892_v0 }
 0x3bf   :  { %9757 = vmatpush3.bf16.msra.mxu0 %v11260_v47 }
 0x3c0   :  { %9758 = vmatprep.subr.bf16.mxu0 %v10892_v0 }
 0x3c3   :  { %9760 = vmatpush3.bf16.msra.mxu0 %v11264_v50 }
 0x3c4   :  { %9761 = vmatprep.subr.bf16.mxu0 %v10892_v0 }
 0x3c7   :  { %9763 = vmatpush3.bf16.msra.mxu0 %v11266_v2 }
 0x3c8   :  { %9764 = vmatprep.subr.bf16.mxu0 %v10892_v0 }
 0x3ca   :  { %8041 = vmatmul.mubr.f32.vlgmr.msra.gmra.mrb[8].mxu0 %v11604_v63 }
 0x3cb   :  { %9766 = vmatpush3.bf16.msra.mxu0 %v11168_v61  ;;  %8075 = vmatprep.mubr.msk.f32.mxu0 %vm10893_vm0, %v10894_v1 }
 0x3cc   :  { %9767 = vmatprep.subr.bf16.mxu0 %v10892_v0 }
 0x3cf   :  { %9769 = vmatpush3.bf16.msra.mxu0 %v11208_v41 }
 0x3d0   :  { %9770 = vmatprep.subr.bf16.mxu0 %v10892_v0 }
 0x3d3   :  { %9772 = vmatpush3.bf16.msra.mxu0 %v11219_v15 }
 0x3d4   :  { %9773 = vmatprep.subr.bf16.mxu0 %v10892_v0 }
 0x3d7   :  { %9775 = vmatpush3.bf16.msra.mxu0 %v11272_v11 }
 0x3d8   :  { %9776 = vmatprep.subr.bf16.mxu0 %v10892_v0 }
 0x3db   :  { %9778 = vmatpush3.bf16.msra.mxu0 %v11286_v48 }
 0x3dc   :  { %9779 = vmatprep.subr.bf16.mxu0 %v10892_v0 }
 0x3df   :  { %9781 = vmatpush3.bf16.msra.mxu0 %v11301_v56 }
 0x3e0   :  { %9782 = vmatprep.subr.bf16.mxu0 %v10892_v0 }
 0x3e3   :  { %9784 = vmatpush3.bf16.msra.mxu0 %v11313_v57 }
 0x3e4   :  { %9785 = vmatprep.subr.bf16.mxu0 %v10892_v0 }
 0x3e7   :  { %9787 = vmatpush3.bf16.msra.mxu0 %v11325_v3 }
 0x3e8   :  { %9932 = vmatprep.subr.bf16.mxu0 %v10892_v0 }
 0x3ea   :  { %8076 = vmatmul.mubr.f32.vlgmr.msra.gmra.mrb[8].mxu0 %v11604_v63 }
 0x3eb   :  { %9934 = vmatpush3.bf16.msra.mxu0 %v11168_v61  ;;  %8320 = vmatprep.mubr.msk.f32.mxu0 %vm10893_vm0, %v10894_v1 }
 0x3ec   :  { %9935 = vmatprep.subr.bf16.mxu0 %v10892_v0 }
 0x3ef   :  { %9937 = vmatpush3.bf16.msra.mxu0 %v11208_v41 }
 0x3f0   :  { %9938 = vmatprep.subr.bf16.mxu0 %v10892_v0 }
 0x3f3   :  { %9940 = vmatpush3.bf16.msra.mxu0 %v11219_v15 }
 0x3f4   :  { %9941 = vmatprep.subr.bf16.mxu0 %v10892_v0 }
 0x3f7   :  { %9943 = vmatpush3.bf16.msra.mxu0 %v11272_v11 }
 0x3f8   :  { %9944 = vmatprep.subr.bf16.mxu0 %v10892_v0 }
 0x3fb   :  { %9946 = vmatpush3.bf16.msra.mxu0 %v11286_v48 }
 0x3fc   :  { %9947 = vmatprep.subr.bf16.mxu0 %v10892_v0 }
 0x3ff   :  { %9949 = vmatpush3.bf16.msra.mxu0 %v11301_v56 }
 0x400   :  { %9950 = vmatprep.subr.bf16.mxu0 %v10892_v0 }
 0x403   :  { %9952 = vmatpush3.bf16.msra.mxu0 %v11313_v57 }
 0x404   :  { %9953 = vmatprep.subr.bf16.mxu0 %v10892_v0 }
 0x407   :  { %9955 = vmatpush3.bf16.msra.mxu0 %v11325_v3 }
 0x408   :  { %9956 = vmatprep.subr.bf16.mxu0 %v10892_v0 }
 0x4bd   :  { %v2477_v5 = vpop.f32.mrb[8].mxu0 }
 0x4be   :  { %v2482_v6 = vrot.slane %v2477_v5, 6  ;;  %v8077_v43 = vpop.f32.mrb[9].mxu0 }
 0x4c0   :  { %v2484_v12 = vadd.f32 %v11478_v31, %v2482_v6 }
 0x4c2   :  { %10756 = vtanh.f32 %v2484_v12 }
 0x4cc   :  { %v10757_v39 = vpop.eup %10756 }
 0x4cd   :  { %v2487_v40 = vmul.f32 0.3, %v10757_v39 }
 0x4cf   :  { %v2489_v14 = vrot.slane %v2487_v40, 2 }
 0x4d1   :  { %v11722_v45 = vadd.f32 %v2489_v14, %v2486_v13 }
 0x4d3   :  { %v11725_v55 = vand.u32 4294901760, %v11722_v45  ;;  %v5756_v30 = vrot.slane %v11722_v45, 6  ;;  %v3138_v63 = vmul.f32 0.7, %v11722_v45 }
 0x4d5   :  { %v11729_v38 = vsel %vm5775_vm3, %v5774_v34, %v5756_v30  ;;  %v2574_v53 = vsub.f32 %v11722_v45, %v11725_v55 }
 0x4d7   :  { %v2575_v54 = vand.u32 4294901760, %v2574_v53 }
 0x4d9   :  { %v2576_v7 = vsub.f32 %v2574_v53, %v2575_v54 }
 0x4db   :  { %v2577_v35 = vand.u32 4294901760, %v2576_v7 }
 0x4dd   :  { %8111 = vmatmul.mubr.f32.vlgmr.msra.gmra.mrb[10].mxu1 %v2577_v35 }
 0x4de   :  { %9814 = vmatpush3.bf16.msra.mxu1 %v11120_v17  ;;  %8145 = vmatprep.mubr.msk.f32.mxu1 %vm10893_vm0, %v10894_v1 }
 0x4df   :  { %9815 = vmatprep.subr.bf16.mxu1 %v10892_v0 }
 0x4e2   :  { %9817 = vmatpush3.bf16.msra.mxu1 %v11173_v16 }
 0x4e3   :  { %9818 = vmatprep.subr.bf16.mxu1 %v10892_v0 }
 0x4e6   :  { %9820 = vmatpush3.bf16.msra.mxu1 %v11211_v18 }
 0x4e7   :  { %9821 = vmatprep.subr.bf16.mxu1 %v10892_v0 }
 0x4ea   :  { %9823 = vmatpush3.bf16.msra.mxu1 %v11222_v10 }
 0x4eb   :  { %9824 = vmatprep.subr.bf16.mxu1 %v10892_v0 }
 0x4ee   :  { %9826 = vmatpush3.bf16.msra.mxu1 %v11277_v49 }
 0x4ef   :  { %9827 = vmatprep.subr.bf16.mxu1 %v10892_v0 }
 0x4f2   :  { %9829 = vmatpush3.bf16.msra.mxu1 %v11290_v42 }
 0x4f3   :  { %9830 = vmatprep.subr.bf16.mxu1 %v10892_v0 }
 0x4f6   :  { %9832 = vmatpush3.bf16.msra.mxu1 %v11304_v4 }
 0x4f7   :  { %9833 = vmatprep.subr.bf16.mxu1 %v10892_v0 }
 0x4fa   :  { %9835 = vmatpush3.bf16.msra.mxu1 %v11316_v62 }
 0x4fb   :  { %9836 = vmatprep.subr.bf16.mxu1 %v10892_v0 }
 0x4fd   :  { %8146 = vmatmul.mubr.f32.vlgmr.msra.gmra.mrb[10].mxu1 %v11725_v55 }
 0x4fe   :  { %9838 = vmatpush3.bf16.msra.mxu1 %v11334_v23  ;;  %8180 = vmatprep.mubr.msk.f32.mxu1 %vm10893_vm0, %v10894_v1 }
 0x4ff   :  { %9839 = vmatprep.subr.bf16.mxu1 %v10892_v0 }
 0x502   :  { %9841 = vmatpush3.bf16.msra.mxu1 %v11345_v25 }
 0x503   :  { %9842 = vmatprep.subr.bf16.mxu1 %v10892_v0 }
 0x506   :  { %9844 = vmatpush3.bf16.msra.mxu1 %v11355_v19 }
 0x507   :  { %9845 = vmatprep.subr.bf16.mxu1 %v10892_v0 }
 0x50a   :  { %9847 = vmatpush3.bf16.msra.mxu1 %v11363_v20 }
 0x50b   :  { %9848 = vmatprep.subr.bf16.mxu1 %v10892_v0 }
 0x50e   :  { %9850 = vmatpush3.bf16.msra.mxu1 %v11371_v33 }
 0x50f   :  { %9851 = vmatprep.subr.bf16.mxu1 %v10892_v0 }
 0x512   :  { %9853 = vmatpush3.bf16.msra.mxu1 %v11379_v37 }
 0x513   :  { %9854 = vmatprep.subr.bf16.mxu1 %v10892_v0 }
 0x516   :  { %9856 = vmatpush3.bf16.msra.mxu1 %v11387_v51 }
 0x517   :  { %9857 = vmatprep.subr.bf16.mxu1 %v10892_v0 }
 0x51a   :  { %9859 = vmatpush3.bf16.msra.mxu1 %v11395_v52 }
 0x51b   :  { %9860 = vmatprep.subr.bf16.mxu1 %v10892_v0 }
 0x51d   :  { %8181 = vmatmul.mubr.f32.vlgmr.msra.gmra.mrb[10].mxu1 %v2574_v53 }
 0x51e   :  { %9862 = vmatpush3.bf16.msra.mxu1 %v11168_v61  ;;  %8215 = vmatprep.mubr.msk.f32.mxu1 %vm10893_vm0, %v10894_v1 }
 0x51f   :  { %9863 = vmatprep.subr.bf16.mxu1 %v10892_v0 }
 0x522   :  { %9865 = vmatpush3.bf16.msra.mxu1 %v11208_v41 }
 0x523   :  { %9866 = vmatprep.subr.bf16.mxu1 %v10892_v0 }
 0x526   :  { %9868 = vmatpush3.bf16.msra.mxu1 %v11219_v15 }
 0x527   :  { %9869 = vmatprep.subr.bf16.mxu1 %v10892_v0 }
 0x52a   :  { %9871 = vmatpush3.bf16.msra.mxu1 %v11272_v11 }
 0x52b   :  { %9872 = vmatprep.subr.bf16.mxu1 %v10892_v0 }
 0x52e   :  { %9874 = vmatpush3.bf16.msra.mxu1 %v11286_v48 }
 0x52f   :  { %9875 = vmatprep.subr.bf16.mxu1 %v10892_v0 }
 0x532   :  { %9877 = vmatpush3.bf16.msra.mxu1 %v11301_v56 }
 0x533   :  { %9878 = vmatprep.subr.bf16.mxu1 %v10892_v0 }
 0x536   :  { %9880 = vmatpush3.bf16.msra.mxu1 %v11313_v57 }
 0x537   :  { %9881 = vmatprep.subr.bf16.mxu1 %v10892_v0 }
 0x53a   :  { %9883 = vmatpush3.bf16.msra.mxu1 %v11325_v3 }
 0x53b   :  { %9884 = vmatprep.subr.bf16.mxu1 %v10892_v0 }
 0x53d   :  { %8216 = vmatmul.mubr.f32.vlgmr.msra.gmra.mrb[10].mxu1 %v2575_v54 }
 0x53e   :  { %9886 = vmatpush3.bf16.msra.mxu1 %v11234_v26  ;;  %8250 = vmatprep.mubr.msk.f32.mxu1 %vm10893_vm0, %v10894_v1 }
 0x53f   :  { %9887 = vmatprep.subr.bf16.mxu1 %v10892_v0 }
 0x542   :  { %9889 = vmatpush3.bf16.msra.mxu1 %v11242_v44 }
 0x543   :  { %9890 = vmatprep.subr.bf16.mxu1 %v10892_v0 }
 0x546   :  { %9892 = vmatpush3.bf16.msra.mxu1 %v11248_v8 }
 0x547   :  { %9893 = vmatprep.subr.bf16.mxu1 %v10892_v0 }
 0x54a   :  { %9895 = vmatpush3.bf16.msra.mxu1 %v11256_v32 }
 0x54b   :  { %9896 = vmatprep.subr.bf16.mxu1 %v10892_v0 }
 0x54e   :  { %9898 = vmatpush3.bf16.msra.mxu1 %v11258_v9 }
 0x54f   :  { %9899 = vmatprep.subr.bf16.mxu1 %v10892_v0 }
 0x552   :  { %9901 = vmatpush3.bf16.msra.mxu1 %v11260_v47 }
 0x553   :  { %9902 = vmatprep.subr.bf16.mxu1 %v10892_v0 }
 0x556   :  { %9904 = vmatpush3.bf16.msra.mxu1 %v11264_v50 }
 0x557   :  { %9905 = vmatprep.subr.bf16.mxu1 %v10892_v0 }
 0x55a   :  { %9907 = vmatpush3.bf16.msra.mxu1 %v11266_v2 }
 0x55b   :  { %9908 = vmatprep.subr.bf16.mxu1 %v10892_v0 }
 0x55d   :  { %8251 = vmatmul.mubr.f32.vlgmr.msra.gmra.mrb[10].mxu1 %v11725_v55 }
 0x55e   :  { %9910 = vmatpush3.bf16.msra.mxu1 %v11168_v61  ;;  %8285 = vmatprep.mubr.msk.f32.mxu1 %vm10893_vm0, %v10894_v1 }
 0x55f   :  { %9911 = vmatprep.subr.bf16.mxu1 %v10892_v0 }
 0x562   :  { %9913 = vmatpush3.bf16.msra.mxu1 %v11208_v41 }
 0x563   :  { %9914 = vmatprep.subr.bf16.mxu1 %v10892_v0 }
 0x566   :  { %9916 = vmatpush3.bf16.msra.mxu1 %v11219_v15 }
 0x567   :  { %9917 = vmatprep.subr.bf16.mxu1 %v10892_v0 }
 0x56a   :  { %9919 = vmatpush3.bf16.msra.mxu1 %v11272_v11 }
 0x56b   :  { %9920 = vmatprep.subr.bf16.mxu1 %v10892_v0 }
 0x56e   :  { %9922 = vmatpush3.bf16.msra.mxu1 %v11286_v48 }
 0x56f   :  { %9923 = vmatprep.subr.bf16.mxu1 %v10892_v0 }
 0x572   :  { %9925 = vmatpush3.bf16.msra.mxu1 %v11301_v56 }
 0x573   :  { %9926 = vmatprep.subr.bf16.mxu1 %v10892_v0 }
 0x576   :  { %9928 = vmatpush3.bf16.msra.mxu1 %v11313_v57 }
 0x577   :  { %9929 = vmatprep.subr.bf16.mxu1 %v10892_v0 }
 0x57a   :  { %9931 = vmatpush3.bf16.msra.mxu1 %v11325_v3 }
 0x57b   :  { %10076 = vmatprep.subr.bf16.mxu1 %v10892_v0 }
 0x57d   :  { %8286 = vmatmul.mubr.f32.vlgmr.msra.gmra.mrb[10].mxu1 %v11725_v55 }
 0x57e   :  { %10078 = vmatpush3.bf16.msra.mxu1 %v11168_v61  ;;  %8530 = vmatprep.mubr.msk.f32.mxu1 %vm10893_vm0, %v10894_v1 }
 0x57f   :  { %10079 = vmatprep.subr.bf16.mxu1 %v10892_v0 }
 0x582   :  { %10081 = vmatpush3.bf16.msra.mxu1 %v11208_v41 }
 0x583   :  { %10082 = vmatprep.subr.bf16.mxu1 %v10892_v0 }
 0x586   :  { %10084 = vmatpush3.bf16.msra.mxu1 %v11219_v15 }
 0x587   :  { %10085 = vmatprep.subr.bf16.mxu1 %v10892_v0 }
 0x58a   :  { %10087 = vmatpush3.bf16.msra.mxu1 %v11272_v11 }
 0x58b   :  { %10088 = vmatprep.subr.bf16.mxu1 %v10892_v0 }
 0x58e   :  { %10090 = vmatpush3.bf16.msra.mxu1 %v11286_v48 }
 0x58f   :  { %10091 = vmatprep.subr.bf16.mxu1 %v10892_v0 }
 0x592   :  { %10093 = vmatpush3.bf16.msra.mxu1 %v11301_v56 }
 0x593   :  { %10094 = vmatprep.subr.bf16.mxu1 %v10892_v0 }
 0x596   :  { %10096 = vmatpush3.bf16.msra.mxu1 %v11313_v57 }
 0x597   :  { %10097 = vmatprep.subr.bf16.mxu1 %v10892_v0 }
 0x59a   :  { %10099 = vmatpush3.bf16.msra.mxu1 %v11325_v3 }
 0x59b   :  { %10100 = vmatprep.subr.bf16.mxu1 %v10892_v0 }
 0x650   :  { %v3129_v24 = vpop.f32.mrb[10].mxu1 }
 0x651   :  { %v3134_v36 = vrot.slane %v3129_v24, 5  ;;  %v8287_v46 = vpop.f32.mrb[11].mxu1 }
 0x653   :  { %v3136_v58 = vadd.f32 %v11478_v31, %v3134_v36 }
 0x655   :  { %10758 = vtanh.f32 %v3136_v58 }
 0x65f   :  { %v10759_v59 = vpop.eup %10758 }
 0x660   :  { %v3139_v60 = vmul.f32 0.3, %v10759_v59 }
 0x662   :  { %v3141_v22 = vrot.slane %v3139_v60, 3 }
 0x664   :  { %v11846_v27 = vadd.f32 %v3141_v22, %v3138_v63 }
 0x666   :  { %v11849_v28 = vand.u32 4294901760, %v11846_v27  ;;  %v5759_v29 = vrot.slane %v11846_v27, 5  ;;  %v3790_v30 = vmul.f32 0.7, %v11846_v27 }
 0x668   :  { %v11853_v5 = vsel %vm5777_vm4, %v11729_v38, %v5759_v29  ;;  %v3226_v6 = vsub.f32 %v11846_v27, %v11849_v28 }
 0x66a   :  { %v3227_v43 = vand.u32 4294901760, %v3226_v6 }
 0x66c   :  { %v3228_v12 = vsub.f32 %v3226_v6, %v3227_v43 }
 0x66e   :  { %v3229_v39 = vand.u32 4294901760, %v3228_v12 }
 0x670   :  { %8321 = vmatmul.mubr.f32.vlgmr.msra.gmra.mrb[10].mxu0 %v3229_v39 }
 0x671   :  { %9958 = vmatpush3.bf16.msra.mxu0 %v11120_v17  ;;  %8355 = vmatprep.mubr.msk.f32.mxu0 %vm10893_vm0, %v10894_v1 }
 0x672   :  { %9959 = vmatprep.subr.bf16.mxu0 %v10892_v0 }
 0x675   :  { %9961 = vmatpush3.bf16.msra.mxu0 %v11173_v16 }
 0x676   :  { %9962 = vmatprep.subr.bf16.mxu0 %v10892_v0 }
 0x679   :  { %9964 = vmatpush3.bf16.msra.mxu0 %v11211_v18 }
 0x67a   :  { %9965 = vmatprep.subr.bf16.mxu0 %v10892_v0 }
 0x67d   :  { %9967 = vmatpush3.bf16.msra.mxu0 %v11222_v10 }
 0x67e   :  { %9968 = vmatprep.subr.bf16.mxu0 %v10892_v0 }
 0x681   :  { %9970 = vmatpush3.bf16.msra.mxu0 %v11277_v49 }
 0x682   :  { %9971 = vmatprep.subr.bf16.mxu0 %v10892_v0 }
 0x685   :  { %9973 = vmatpush3.bf16.msra.mxu0 %v11290_v42 }
 0x686   :  { %9974 = vmatprep.subr.bf16.mxu0 %v10892_v0 }
 0x689   :  { %9976 = vmatpush3.bf16.msra.mxu0 %v11304_v4 }
 0x68a   :  { %9977 = vmatprep.subr.bf16.mxu0 %v10892_v0 }
 0x68d   :  { %9979 = vmatpush3.bf16.msra.mxu0 %v11316_v62 }
 0x68e   :  { %9980 = vmatprep.subr.bf16.mxu0 %v10892_v0 }
 0x690   :  { %8356 = vmatmul.mubr.f32.vlgmr.msra.gmra.mrb[10].mxu0 %v11849_v28 }
 0x691   :  { %9982 = vmatpush3.bf16.msra.mxu0 %v11334_v23  ;;  %8390 = vmatprep.mubr.msk.f32.mxu0 %vm10893_vm0, %v10894_v1 }
 0x692   :  { %9983 = vmatprep.subr.bf16.mxu0 %v10892_v0 }
 0x695   :  { %9985 = vmatpush3.bf16.msra.mxu0 %v11345_v25 }
 0x696   :  { %9986 = vmatprep.subr.bf16.mxu0 %v10892_v0 }
 0x699   :  { %9988 = vmatpush3.bf16.msra.mxu0 %v11355_v19 }
 0x69a   :  { %9989 = vmatprep.subr.bf16.mxu0 %v10892_v0 }
 0x69d   :  { %9991 = vmatpush3.bf16.msra.mxu0 %v11363_v20 }
 0x69e   :  { %9992 = vmatprep.subr.bf16.mxu0 %v10892_v0 }
 0x6a1   :  { %9994 = vmatpush3.bf16.msra.mxu0 %v11371_v33 }
 0x6a2   :  { %9995 = vmatprep.subr.bf16.mxu0 %v10892_v0 }
 0x6a5   :  { %9997 = vmatpush3.bf16.msra.mxu0 %v11379_v37 }
 0x6a6   :  { %9998 = vmatprep.subr.bf16.mxu0 %v10892_v0 }
 0x6a9   :  { %10000 = vmatpush3.bf16.msra.mxu0 %v11387_v51 }
 0x6aa   :  { %10001 = vmatprep.subr.bf16.mxu0 %v10892_v0 }
 0x6ad   :  { %10003 = vmatpush3.bf16.msra.mxu0 %v11395_v52 }
 0x6ae   :  { %10004 = vmatprep.subr.bf16.mxu0 %v10892_v0 }
 0x6b0   :  { %8391 = vmatmul.mubr.f32.vlgmr.msra.gmra.mrb[10].mxu0 %v3226_v6 }
 0x6b1   :  { %10006 = vmatpush3.bf16.msra.mxu0 %v11168_v61  ;;  %8425 = vmatprep.mubr.msk.f32.mxu0 %vm10893_vm0, %v10894_v1 }
 0x6b2   :  { %10007 = vmatprep.subr.bf16.mxu0 %v10892_v0 }
 0x6b5   :  { %10009 = vmatpush3.bf16.msra.mxu0 %v11208_v41 }
 0x6b6   :  { %10010 = vmatprep.subr.bf16.mxu0 %v10892_v0 }
 0x6b9   :  { %10012 = vmatpush3.bf16.msra.mxu0 %v11219_v15 }
 0x6ba   :  { %10013 = vmatprep.subr.bf16.mxu0 %v10892_v0 }
 0x6bd   :  { %10015 = vmatpush3.bf16.msra.mxu0 %v11272_v11 }
 0x6be   :  { %10016 = vmatprep.subr.bf16.mxu0 %v10892_v0 }
 0x6c1   :  { %10018 = vmatpush3.bf16.msra.mxu0 %v11286_v48 }
 0x6c2   :  { %10019 = vmatprep.subr.bf16.mxu0 %v10892_v0 }
 0x6c5   :  { %10021 = vmatpush3.bf16.msra.mxu0 %v11301_v56 }
 0x6c6   :  { %10022 = vmatprep.subr.bf16.mxu0 %v10892_v0 }
 0x6c9   :  { %10024 = vmatpush3.bf16.msra.mxu0 %v11313_v57 }
 0x6ca   :  { %10025 = vmatprep.subr.bf16.mxu0 %v10892_v0 }
 0x6cd   :  { %10027 = vmatpush3.bf16.msra.mxu0 %v11325_v3 }
 0x6ce   :  { %10028 = vmatprep.subr.bf16.mxu0 %v10892_v0 }
 0x6d0   :  { %8426 = vmatmul.mubr.f32.vlgmr.msra.gmra.mrb[10].mxu0 %v3227_v43 }
 0x6d1   :  { %10030 = vmatpush3.bf16.msra.mxu0 %v11234_v26  ;;  %8460 = vmatprep.mubr.msk.f32.mxu0 %vm10893_vm0, %v10894_v1 }
 0x6d2   :  { %10031 = vmatprep.subr.bf16.mxu0 %v10892_v0 }
 0x6d5   :  { %10033 = vmatpush3.bf16.msra.mxu0 %v11242_v44 }
 0x6d6   :  { %10034 = vmatprep.subr.bf16.mxu0 %v10892_v0 }
 0x6d9   :  { %10036 = vmatpush3.bf16.msra.mxu0 %v11248_v8 }
 0x6da   :  { %10037 = vmatprep.subr.bf16.mxu0 %v10892_v0 }
 0x6dd   :  { %10039 = vmatpush3.bf16.msra.mxu0 %v11256_v32 }
 0x6de   :  { %10040 = vmatprep.subr.bf16.mxu0 %v10892_v0 }
 0x6e1   :  { %10042 = vmatpush3.bf16.msra.mxu0 %v11258_v9 }
 0x6e2   :  { %10043 = vmatprep.subr.bf16.mxu0 %v10892_v0 }
 0x6e5   :  { %10045 = vmatpush3.bf16.msra.mxu0 %v11260_v47 }
 0x6e6   :  { %10046 = vmatprep.subr.bf16.mxu0 %v10892_v0 }
 0x6e9   :  { %10048 = vmatpush3.bf16.msra.mxu0 %v11264_v50 }
 0x6ea   :  { %10049 = vmatprep.subr.bf16.mxu0 %v10892_v0 }
 0x6ed   :  { %10051 = vmatpush3.bf16.msra.mxu0 %v11266_v2 }
 0x6ee   :  { %10052 = vmatprep.subr.bf16.mxu0 %v10892_v0 }
 0x6f0   :  { %8461 = vmatmul.mubr.f32.vlgmr.msra.gmra.mrb[10].mxu0 %v11849_v28 }
 0x6f1   :  { %10054 = vmatpush3.bf16.msra.mxu0 %v11168_v61  ;;  %8495 = vmatprep.mubr.msk.f32.mxu0 %vm10893_vm0, %v10894_v1 }
 0x6f2   :  { %10055 = vmatprep.subr.bf16.mxu0 %v10892_v0 }
 0x6f5   :  { %10057 = vmatpush3.bf16.msra.mxu0 %v11208_v41 }
 0x6f6   :  { %10058 = vmatprep.subr.bf16.mxu0 %v10892_v0 }
 0x6f9   :  { %10060 = vmatpush3.bf16.msra.mxu0 %v11219_v15 }
 0x6fa   :  { %10061 = vmatprep.subr.bf16.mxu0 %v10892_v0 }
 0x6fd   :  { %10063 = vmatpush3.bf16.msra.mxu0 %v11272_v11 }
 0x6fe   :  { %10064 = vmatprep.subr.bf16.mxu0 %v10892_v0 }
 0x701   :  { %10066 = vmatpush3.bf16.msra.mxu0 %v11286_v48 }
 0x702   :  { %10067 = vmatprep.subr.bf16.mxu0 %v10892_v0 }
 0x705   :  { %10069 = vmatpush3.bf16.msra.mxu0 %v11301_v56 }
 0x706   :  { %10070 = vmatprep.subr.bf16.mxu0 %v10892_v0 }
 0x709   :  { %10072 = vmatpush3.bf16.msra.mxu0 %v11313_v57 }
 0x70a   :  { %10073 = vmatprep.subr.bf16.mxu0 %v10892_v0 }
 0x70d   :  { %10075 = vmatpush3.bf16.msra.mxu0 %v11325_v3 }
 0x70e   :  { %10220 = vmatprep.subr.bf16.mxu0 %v10892_v0 }
 0x710   :  { %8496 = vmatmul.mubr.f32.vlgmr.msra.gmra.mrb[10].mxu0 %v11849_v28 }
 0x711   :  { %10222 = vmatpush3.bf16.msra.mxu0 %v11168_v61  ;;  %8740 = vmatprep.mubr.msk.f32.mxu0 %vm10893_vm0, %v10894_v1 }
 0x712   :  { %10223 = vmatprep.subr.bf16.mxu0 %v10892_v0 }
 0x715   :  { %10225 = vmatpush3.bf16.msra.mxu0 %v11208_v41 }
 0x716   :  { %10226 = vmatprep.subr.bf16.mxu0 %v10892_v0 }
 0x719   :  { %10228 = vmatpush3.bf16.msra.mxu0 %v11219_v15 }
 0x71a   :  { %10229 = vmatprep.subr.bf16.mxu0 %v10892_v0 }
 0x71d   :  { %10231 = vmatpush3.bf16.msra.mxu0 %v11272_v11 }
 0x71e   :  { %10232 = vmatprep.subr.bf16.mxu0 %v10892_v0 }
 0x721   :  { %10234 = vmatpush3.bf16.msra.mxu0 %v11286_v48 }
 0x722   :  { %10235 = vmatprep.subr.bf16.mxu0 %v10892_v0 }
 0x725   :  { %10237 = vmatpush3.bf16.msra.mxu0 %v11301_v56 }
 0x726   :  { %10238 = vmatprep.subr.bf16.mxu0 %v10892_v0 }
 0x729   :  { %10240 = vmatpush3.bf16.msra.mxu0 %v11313_v57 }
 0x72a   :  { %10241 = vmatprep.subr.bf16.mxu0 %v10892_v0 }
 0x72d   :  { %10243 = vmatpush3.bf16.msra.mxu0 %v11325_v3 }
 0x72e   :  { %10244 = vmatprep.subr.bf16.mxu0 %v10892_v0 }
 0x7e3   :  { %v3781_v40 = vpop.f32.mrb[10].mxu0 }
 0x7e4   :  { %v3786_v13 = vrot.slane %v3781_v40, 4  ;;  %v8497_v14 = vpop.f32.mrb[11].mxu0 }
 0x7e6   :  { %v3788_v21 = vadd.f32 %v11478_v31, %v3786_v13 }
 0x7e8   :  { %10760 = vtanh.f32 %v3788_v21 }
 0x7f2   :  { %v10761_v45 = vpop.eup %10760 }
 0x7f3   :  { %v3791_v55 = vmul.f32 0.3, %v10761_v45 }
 0x7f5   :  { %v3793_v34 = vrot.slane %v3791_v55, 4 }
 0x7f7   :  { %v11970_v38 = vadd.f32 %v3793_v34, %v3790_v30 }
 0x7f9   :  { %v11973_v53 = vand.u32 4294901760, %v11970_v38  ;;  %v5762_v54 = vrot.slane %v11970_v38, 4  ;;  %v4442_v28 = vmul.f32 0.7, %v11970_v38 }
 0x7fb   :  { %v3878_v7 = vsub.f32 %v11970_v38, %v11973_v53  ;;  %v11979_v35 = vsel %vm5779_vm5, %v11853_v5, %v5762_v54 }
 0x7fd   :  { %v3879_v24 = vand.u32 4294901760, %v3878_v7 }
 0x7ff   :  { %v3880_v36 = vsub.f32 %v3878_v7, %v3879_v24 }
 0x801   :  { %v3881_v46 = vand.u32 4294901760, %v3880_v36 }
 0x803   :  { %8531 = vmatmul.mubr.f32.vlgmr.msra.gmra.mrb[12].mxu1 %v3881_v46 }
 0x804   :  { %10102 = vmatpush3.bf16.msra.mxu1 %v11120_v17  ;;  %8565 = vmatprep.mubr.msk.f32.mxu1 %vm10893_vm0, %v10894_v1 }
 0x805   :  { %10103 = vmatprep.subr.bf16.mxu1 %v10892_v0 }
 0x808   :  { %10105 = vmatpush3.bf16.msra.mxu1 %v11173_v16 }
 0x809   :  { %10106 = vmatprep.subr.bf16.mxu1 %v10892_v0 }
 0x80c   :  { %10108 = vmatpush3.bf16.msra.mxu1 %v11211_v18 }
 0x80d   :  { %10109 = vmatprep.subr.bf16.mxu1 %v10892_v0 }
 0x810   :  { %10111 = vmatpush3.bf16.msra.mxu1 %v11222_v10 }
 0x811   :  { %10112 = vmatprep.subr.bf16.mxu1 %v10892_v0 }
 0x814   :  { %10114 = vmatpush3.bf16.msra.mxu1 %v11277_v49 }
 0x815   :  { %10115 = vmatprep.subr.bf16.mxu1 %v10892_v0 }
 0x818   :  { %10117 = vmatpush3.bf16.msra.mxu1 %v11290_v42 }
 0x819   :  { %10118 = vmatprep.subr.bf16.mxu1 %v10892_v0 }
 0x81c   :  { %10120 = vmatpush3.bf16.msra.mxu1 %v11304_v4 }
 0x81d   :  { %10121 = vmatprep.subr.bf16.mxu1 %v10892_v0 }
 0x820   :  { %10123 = vmatpush3.bf16.msra.mxu1 %v11316_v62 }
 0x821   :  { %10124 = vmatprep.subr.bf16.mxu1 %v10892_v0 }
 0x823   :  { %8566 = vmatmul.mubr.f32.vlgmr.msra.gmra.mrb[12].mxu1 %v11973_v53 }
 0x824   :  { %10126 = vmatpush3.bf16.msra.mxu1 %v11334_v23  ;;  %8600 = vmatprep.mubr.msk.f32.mxu1 %vm10893_vm0, %v10894_v1 }
 0x825   :  { %10127 = vmatprep.subr.bf16.mxu1 %v10892_v0 }
 0x828   :  { %10129 = vmatpush3.bf16.msra.mxu1 %v11345_v25 }
 0x829   :  { %10130 = vmatprep.subr.bf16.mxu1 %v10892_v0 }
 0x82c   :  { %10132 = vmatpush3.bf16.msra.mxu1 %v11355_v19 }
 0x82d   :  { %10133 = vmatprep.subr.bf16.mxu1 %v10892_v0 }
 0x830   :  { %10135 = vmatpush3.bf16.msra.mxu1 %v11363_v20 }
 0x831   :  { %10136 = vmatprep.subr.bf16.mxu1 %v10892_v0 }
 0x834   :  { %10138 = vmatpush3.bf16.msra.mxu1 %v11371_v33 }
 0x835   :  { %10139 = vmatprep.subr.bf16.mxu1 %v10892_v0 }
 0x838   :  { %10141 = vmatpush3.bf16.msra.mxu1 %v11379_v37 }
 0x839   :  { %10142 = vmatprep.subr.bf16.mxu1 %v10892_v0 }
 0x83c   :  { %10144 = vmatpush3.bf16.msra.mxu1 %v11387_v51 }
 0x83d   :  { %10145 = vmatprep.subr.bf16.mxu1 %v10892_v0 }
 0x840   :  { %10147 = vmatpush3.bf16.msra.mxu1 %v11395_v52 }
 0x841   :  { %10148 = vmatprep.subr.bf16.mxu1 %v10892_v0 }
 0x843   :  { %8601 = vmatmul.mubr.f32.vlgmr.msra.gmra.mrb[12].mxu1 %v3878_v7 }
 0x844   :  { %10150 = vmatpush3.bf16.msra.mxu1 %v11168_v61  ;;  %8635 = vmatprep.mubr.msk.f32.mxu1 %vm10893_vm0, %v10894_v1 }
 0x845   :  { %10151 = vmatprep.subr.bf16.mxu1 %v10892_v0 }
 0x848   :  { %10153 = vmatpush3.bf16.msra.mxu1 %v11208_v41 }
 0x849   :  { %10154 = vmatprep.subr.bf16.mxu1 %v10892_v0 }
 0x84c   :  { %10156 = vmatpush3.bf16.msra.mxu1 %v11219_v15 }
 0x84d   :  { %10157 = vmatprep.subr.bf16.mxu1 %v10892_v0 }
 0x850   :  { %10159 = vmatpush3.bf16.msra.mxu1 %v11272_v11 }
 0x851   :  { %10160 = vmatprep.subr.bf16.mxu1 %v10892_v0 }
 0x854   :  { %10162 = vmatpush3.bf16.msra.mxu1 %v11286_v48 }
 0x855   :  { %10163 = vmatprep.subr.bf16.mxu1 %v10892_v0 }
 0x858   :  { %10165 = vmatpush3.bf16.msra.mxu1 %v11301_v56 }
 0x859   :  { %10166 = vmatprep.subr.bf16.mxu1 %v10892_v0 }
 0x85c   :  { %10168 = vmatpush3.bf16.msra.mxu1 %v11313_v57 }
 0x85d   :  { %10169 = vmatprep.subr.bf16.mxu1 %v10892_v0 }
 0x860   :  { %10171 = vmatpush3.bf16.msra.mxu1 %v11325_v3 }
 0x861   :  { %10172 = vmatprep.subr.bf16.mxu1 %v10892_v0 }
 0x863   :  { %8636 = vmatmul.mubr.f32.vlgmr.msra.gmra.mrb[12].mxu1 %v3879_v24 }
 0x864   :  { %10174 = vmatpush3.bf16.msra.mxu1 %v11234_v26  ;;  %8670 = vmatprep.mubr.msk.f32.mxu1 %vm10893_vm0, %v10894_v1 }
 0x865   :  { %10175 = vmatprep.subr.bf16.mxu1 %v10892_v0 }
 0x868   :  { %10177 = vmatpush3.bf16.msra.mxu1 %v11242_v44 }
 0x869   :  { %10178 = vmatprep.subr.bf16.mxu1 %v10892_v0 }
 0x86c   :  { %10180 = vmatpush3.bf16.msra.mxu1 %v11248_v8 }
 0x86d   :  { %10181 = vmatprep.subr.bf16.mxu1 %v10892_v0 }
 0x870   :  { %10183 = vmatpush3.bf16.msra.mxu1 %v11256_v32 }
 0x871   :  { %10184 = vmatprep.subr.bf16.mxu1 %v10892_v0 }
 0x874   :  { %10186 = vmatpush3.bf16.msra.mxu1 %v11258_v9 }
 0x875   :  { %10187 = vmatprep.subr.bf16.mxu1 %v10892_v0 }
 0x878   :  { %10189 = vmatpush3.bf16.msra.mxu1 %v11260_v47 }
 0x879   :  { %10190 = vmatprep.subr.bf16.mxu1 %v10892_v0 }
 0x87c   :  { %10192 = vmatpush3.bf16.msra.mxu1 %v11264_v50 }
 0x87d   :  { %10193 = vmatprep.subr.bf16.mxu1 %v10892_v0 }
 0x880   :  { %10195 = vmatpush3.bf16.msra.mxu1 %v11266_v2 }
 0x881   :  { %10196 = vmatprep.subr.bf16.mxu1 %v10892_v0 }
 0x883   :  { %8671 = vmatmul.mubr.f32.vlgmr.msra.gmra.mrb[12].mxu1 %v11973_v53 }
 0x884   :  { %10198 = vmatpush3.bf16.msra.mxu1 %v11168_v61  ;;  %8705 = vmatprep.mubr.msk.f32.mxu1 %vm10893_vm0, %v10894_v1 }
 0x885   :  { %10199 = vmatprep.subr.bf16.mxu1 %v10892_v0 }
 0x888   :  { %10201 = vmatpush3.bf16.msra.mxu1 %v11208_v41 }
 0x889   :  { %10202 = vmatprep.subr.bf16.mxu1 %v10892_v0 }
 0x88c   :  { %10204 = vmatpush3.bf16.msra.mxu1 %v11219_v15 }
 0x88d   :  { %10205 = vmatprep.subr.bf16.mxu1 %v10892_v0 }
 0x890   :  { %10207 = vmatpush3.bf16.msra.mxu1 %v11272_v11 }
 0x891   :  { %10208 = vmatprep.subr.bf16.mxu1 %v10892_v0 }
 0x894   :  { %10210 = vmatpush3.bf16.msra.mxu1 %v11286_v48 }
 0x895   :  { %10211 = vmatprep.subr.bf16.mxu1 %v10892_v0 }
 0x898   :  { %10213 = vmatpush3.bf16.msra.mxu1 %v11301_v56 }
 0x899   :  { %10214 = vmatprep.subr.bf16.mxu1 %v10892_v0 }
 0x89c   :  { %10216 = vmatpush3.bf16.msra.mxu1 %v11313_v57 }
 0x89d   :  { %10217 = vmatprep.subr.bf16.mxu1 %v10892_v0 }
 0x8a0   :  { %10219 = vmatpush3.bf16.msra.mxu1 %v11325_v3 }
 0x8a1   :  { %10364 = vmatprep.subr.bf16.mxu1 %v10892_v0 }
 0x8a3   :  { %8706 = vmatmul.mubr.f32.vlgmr.msra.gmra.mrb[12].mxu1 %v11973_v53 }
 0x8a4   :  { %10366 = vmatpush3.bf16.msra.mxu1 %v11168_v61  ;;  %8950 = vmatprep.mubr.msk.f32.mxu1 %vm10893_vm0, %v10894_v1 }
 0x8a5   :  { %10367 = vmatprep.subr.bf16.mxu1 %v10892_v0 }
 0x8a8   :  { %10369 = vmatpush3.bf16.msra.mxu1 %v11208_v41 }
 0x8a9   :  { %10370 = vmatprep.subr.bf16.mxu1 %v10892_v0 }
 0x8ac   :  { %10372 = vmatpush3.bf16.msra.mxu1 %v11219_v15 }
 0x8ad   :  { %10373 = vmatprep.subr.bf16.mxu1 %v10892_v0 }
 0x8b0   :  { %10375 = vmatpush3.bf16.msra.mxu1 %v11272_v11 }
 0x8b1   :  { %10376 = vmatprep.subr.bf16.mxu1 %v10892_v0 }
 0x8b4   :  { %10378 = vmatpush3.bf16.msra.mxu1 %v11286_v48 }
 0x8b5   :  { %10379 = vmatprep.subr.bf16.mxu1 %v10892_v0 }
 0x8b8   :  { %10381 = vmatpush3.bf16.msra.mxu1 %v11301_v56 }
 0x8b9   :  { %10382 = vmatprep.subr.bf16.mxu1 %v10892_v0 }
 0x8bc   :  { %10384 = vmatpush3.bf16.msra.mxu1 %v11313_v57 }
 0x8bd   :  { %10385 = vmatprep.subr.bf16.mxu1 %v10892_v0 }
 0x8c0   :  { %10387 = vmatpush3.bf16.msra.mxu1 %v11325_v3 }
 0x8c1   :  { %10388 = vmatprep.subr.bf16.mxu1 %v10892_v0 }
 0x976   :  { %v4433_v58 = vpop.f32.mrb[12].mxu1 }
 0x977   :  { %v4438_v59 = vrot.slane %v4433_v58, 3  ;;  %v8707_v60 = vpop.f32.mrb[13].mxu1 }
 0x979   :  { %v4440_v63 = vadd.f32 %v11478_v31, %v4438_v59 }
 0x97b   :  { %10762 = vtanh.f32 %v4440_v63 }
 0x985   :  { %v10763_v22 = vpop.eup %10762 }
 0x986   :  { %v4443_v27 = vmul.f32 0.3, %v10763_v22 }
 0x988   :  { %v4445_v29 = vrot.slane %v4443_v27, 5 }
 0x98a   :  { %v12094_v5 = vadd.f32 %v4445_v29, %v4442_v28 }
 0x98c   :  { %v12097_v6 = vand.u32 4294901760, %v12094_v5  ;;  %v5765_v43 = vrot.slane %v12094_v5, 3  ;;  %v5094_v53 = vmul.f32 0.7, %v12094_v5 }
 0x98e   :  { %v4530_v12 = vsub.f32 %v12094_v5, %v12097_v6  ;;  %v12103_v39 = vsel %vm5781_vm6, %v11979_v35, %v5765_v43 }
 0x990   :  { %v4531_v40 = vand.u32 4294901760, %v4530_v12 }
 0x992   :  { %v4532_v13 = vsub.f32 %v4530_v12, %v4531_v40 }
 0x994   :  { %v4533_v14 = vand.u32 4294901760, %v4532_v13  ;;  %v5802_v13 = vld [vmem:[#allocation8 + $0x78] sm:$0xff] }
 0x996   :  { %8741 = vmatmul.mubr.f32.vlgmr.msra.gmra.mrb[12].mxu0 %v4533_v14 }
 0x997   :  { %10246 = vmatpush3.bf16.msra.mxu0 %v11120_v17  ;;  %8775 = vmatprep.mubr.msk.f32.mxu0 %vm10893_vm0, %v10894_v1 }
 0x998   :  { %10247 = vmatprep.subr.bf16.mxu0 %v10892_v0 }
 0x99b   :  { %10249 = vmatpush3.bf16.msra.mxu0 %v11173_v16 }
 0x99c   :  { %10250 = vmatprep.subr.bf16.mxu0 %v10892_v0 }
 0x99f   :  { %10252 = vmatpush3.bf16.msra.mxu0 %v11211_v18 }
 0x9a0   :  { %10253 = vmatprep.subr.bf16.mxu0 %v10892_v0 }
 0x9a3   :  { %10255 = vmatpush3.bf16.msra.mxu0 %v11222_v10 }
 0x9a4   :  { %10256 = vmatprep.subr.bf16.mxu0 %v10892_v0 }
 0x9a7   :  { %10258 = vmatpush3.bf16.msra.mxu0 %v11277_v49 }
 0x9a8   :  { %10259 = vmatprep.subr.bf16.mxu0 %v10892_v0 }
 0x9ab   :  { %10261 = vmatpush3.bf16.msra.mxu0 %v11290_v42 }
 0x9ac   :  { %10262 = vmatprep.subr.bf16.mxu0 %v10892_v0 }
 0x9af   :  { %10264 = vmatpush3.bf16.msra.mxu0 %v11304_v4 }
 0x9b0   :  { %10265 = vmatprep.subr.bf16.mxu0 %v10892_v0 }
 0x9b3   :  { %10267 = vmatpush3.bf16.msra.mxu0 %v11316_v62 }
 0x9b4   :  { %10268 = vmatprep.subr.bf16.mxu0 %v10892_v0 }
 0x9b6   :  { %8776 = vmatmul.mubr.f32.vlgmr.msra.gmra.mrb[12].mxu0 %v12097_v6 }
 0x9b7   :  { %10270 = vmatpush3.bf16.msra.mxu0 %v11334_v23  ;;  %8810 = vmatprep.mubr.msk.f32.mxu0 %vm10893_vm0, %v10894_v1 }
 0x9b8   :  { %10271 = vmatprep.subr.bf16.mxu0 %v10892_v0 }
 0x9bb   :  { %10273 = vmatpush3.bf16.msra.mxu0 %v11345_v25 }
 0x9bc   :  { %10274 = vmatprep.subr.bf16.mxu0 %v10892_v0 }
 0x9bf   :  { %10276 = vmatpush3.bf16.msra.mxu0 %v11355_v19 }
 0x9c0   :  { %10277 = vmatprep.subr.bf16.mxu0 %v10892_v0 }
 0x9c3   :  { %10279 = vmatpush3.bf16.msra.mxu0 %v11363_v20 }
 0x9c4   :  { %10280 = vmatprep.subr.bf16.mxu0 %v10892_v0 }
 0x9c7   :  { %10282 = vmatpush3.bf16.msra.mxu0 %v11371_v33 }
 0x9c8   :  { %10283 = vmatprep.subr.bf16.mxu0 %v10892_v0 }
 0x9cb   :  { %10285 = vmatpush3.bf16.msra.mxu0 %v11379_v37 }
 0x9cc   :  { %10286 = vmatprep.subr.bf16.mxu0 %v10892_v0 }
 0x9cf   :  { %10288 = vmatpush3.bf16.msra.mxu0 %v11387_v51 }
 0x9d0   :  { %10289 = vmatprep.subr.bf16.mxu0 %v10892_v0 }
 0x9d3   :  { %10291 = vmatpush3.bf16.msra.mxu0 %v11395_v52 }
 0x9d4   :  { %10292 = vmatprep.subr.bf16.mxu0 %v10892_v0 }
 0x9d6   :  { %8811 = vmatmul.mubr.f32.vlgmr.msra.gmra.mrb[12].mxu0 %v4530_v12 }
 0x9d7   :  { %10294 = vmatpush3.bf16.msra.mxu0 %v11168_v61  ;;  %8845 = vmatprep.mubr.msk.f32.mxu0 %vm10893_vm0, %v10894_v1 }
 0x9d8   :  { %10295 = vmatprep.subr.bf16.mxu0 %v10892_v0 }
 0x9db   :  { %10297 = vmatpush3.bf16.msra.mxu0 %v11208_v41 }
 0x9dc   :  { %10298 = vmatprep.subr.bf16.mxu0 %v10892_v0 }
 0x9df   :  { %10300 = vmatpush3.bf16.msra.mxu0 %v11219_v15 }
 0x9e0   :  { %10301 = vmatprep.subr.bf16.mxu0 %v10892_v0 }
 0x9e3   :  { %10303 = vmatpush3.bf16.msra.mxu0 %v11272_v11 }
 0x9e4   :  { %10304 = vmatprep.subr.bf16.mxu0 %v10892_v0 }
 0x9e7   :  { %10306 = vmatpush3.bf16.msra.mxu0 %v11286_v48 }
 0x9e8   :  { %10307 = vmatprep.subr.bf16.mxu0 %v10892_v0 }
 0x9eb   :  { %10309 = vmatpush3.bf16.msra.mxu0 %v11301_v56 }
 0x9ec   :  { %10310 = vmatprep.subr.bf16.mxu0 %v10892_v0 }
 0x9ef   :  { %10312 = vmatpush3.bf16.msra.mxu0 %v11313_v57 }
 0x9f0   :  { %10313 = vmatprep.subr.bf16.mxu0 %v10892_v0 }
 0x9f3   :  { %10315 = vmatpush3.bf16.msra.mxu0 %v11325_v3 }
 0x9f4   :  { %10316 = vmatprep.subr.bf16.mxu0 %v10892_v0 }
 0x9f6   :  { %8846 = vmatmul.mubr.f32.vlgmr.msra.gmra.mrb[12].mxu0 %v4531_v40 }
 0x9f7   :  { %10318 = vmatpush3.bf16.msra.mxu0 %v11234_v26  ;;  %8880 = vmatprep.mubr.msk.f32.mxu0 %vm10893_vm0, %v10894_v1 }
 0x9f8   :  { %10319 = vmatprep.subr.bf16.mxu0 %v10892_v0 }
 0x9fb   :  { %10321 = vmatpush3.bf16.msra.mxu0 %v11242_v44 }
 0x9fc   :  { %10322 = vmatprep.subr.bf16.mxu0 %v10892_v0 }
 0x9ff   :  { %10324 = vmatpush3.bf16.msra.mxu0 %v11248_v8 }
 0xa00   :  { %10325 = vmatprep.subr.bf16.mxu0 %v10892_v0 }
 0xa03   :  { %10327 = vmatpush3.bf16.msra.mxu0 %v11256_v32 }
 0xa04   :  { %10328 = vmatprep.subr.bf16.mxu0 %v10892_v0 }
 0xa07   :  { %10330 = vmatpush3.bf16.msra.mxu0 %v11258_v9 }
 0xa08   :  { %10331 = vmatprep.subr.bf16.mxu0 %v10892_v0 }
 0xa0b   :  { %10333 = vmatpush3.bf16.msra.mxu0 %v11260_v47 }
 0xa0c   :  { %10334 = vmatprep.subr.bf16.mxu0 %v10892_v0 }
 0xa0f   :  { %10336 = vmatpush3.bf16.msra.mxu0 %v11264_v50 }
 0xa10   :  { %10337 = vmatprep.subr.bf16.mxu0 %v10892_v0 }
 0xa13   :  { %10339 = vmatpush3.bf16.msra.mxu0 %v11266_v2 }
 0xa14   :  { %10340 = vmatprep.subr.bf16.mxu0 %v10892_v0 }
 0xa16   :  { %8881 = vmatmul.mubr.f32.vlgmr.msra.gmra.mrb[12].mxu0 %v12097_v6 }
 0xa17   :  { %10342 = vmatpush3.bf16.msra.mxu0 %v11168_v61  ;;  %8915 = vmatprep.mubr.msk.f32.mxu0 %vm10893_vm0, %v10894_v1 }
 0xa18   :  { %10343 = vmatprep.subr.bf16.mxu0 %v10892_v0 }
 0xa1b   :  { %10345 = vmatpush3.bf16.msra.mxu0 %v11208_v41 }
 0xa1c   :  { %10346 = vmatprep.subr.bf16.mxu0 %v10892_v0 }
 0xa1f   :  { %10348 = vmatpush3.bf16.msra.mxu0 %v11219_v15 }
 0xa20   :  { %10349 = vmatprep.subr.bf16.mxu0 %v10892_v0 }
 0xa23   :  { %10351 = vmatpush3.bf16.msra.mxu0 %v11272_v11 }
 0xa24   :  { %10352 = vmatprep.subr.bf16.mxu0 %v10892_v0 }
 0xa27   :  { %10354 = vmatpush3.bf16.msra.mxu0 %v11286_v48 }
 0xa28   :  { %10355 = vmatprep.subr.bf16.mxu0 %v10892_v0 }
 0xa2b   :  { %10357 = vmatpush3.bf16.msra.mxu0 %v11301_v56 }
 0xa2c   :  { %10358 = vmatprep.subr.bf16.mxu0 %v10892_v0 }
 0xa2f   :  { %10360 = vmatpush3.bf16.msra.mxu0 %v11313_v57 }
 0xa30   :  { %10361 = vmatprep.subr.bf16.mxu0 %v10892_v0 }
 0xa33   :  { %10363 = vmatpush3.bf16.msra.mxu0 %v11325_v3 }
 0xa34   :  { %10508 = vmatprep.subr.bf16.mxu0 %v10892_v0 }
 0xa36   :  { %8916 = vmatmul.mubr.f32.vlgmr.msra.gmra.mrb[12].mxu0 %v12097_v6  ;;  %v5801_v6 = vld [vmem:[#allocation8 + $0x70] sm:$0xff] }
 0xa37   :  { %9160 = vmatprep.mubr.msk.f32.mxu0 %vm10893_vm0, %v10894_v1 }
 0xb09   :  { %v5085_v21 = vpop.f32.mrb[12].mxu0 }
 0xb0a   :  { %v5090_v45 = vrot.slane %v5085_v21, 2  ;;  %v8917_v55 = vpop.f32.mrb[13].mxu0 }
 0xb0c   :  { %v5092_v30 = vadd.f32 %v11478_v31, %v5090_v45 }
 0xb0e   :  { %10764 = vtanh.f32 %v5092_v30 }
 0xb18   :  { %v10765_v34 = vpop.eup %10764 }
 0xb19   :  { %v5095_v38 = vmul.f32 0.3, %v10765_v34 }
 0xb1b   :  { %v5097_v54 = vrot.slane %v5095_v38, 6 }
 0xb1d   :  { %v12202_v7 = vadd.f32 %v5097_v54, %v5094_v53  ;;  %v5853_v53 = vand.u32 4294901760, %v5801_v6  ;;  %v5856_v54 = vand.u32 4294901760, %v5802_v13 }
 0xb1f   :  { %v12205_v35 = vand.u32 4294901760, %v12202_v7  ;;  %v5768_v24 = vrot.slane %v12202_v7, 2 }
 0xb21   :  { %v5182_v36 = vsub.f32 %v12202_v7, %v12205_v35  ;;  %v12211_v46 = vsel %vm5783_vm7, %v12103_v39, %v5768_v24 }
 0xb23   :  { %v5183_v58 = vand.u32 4294901760, %v5182_v36 }
 0xb25   :  { %v5184_v59 = vsub.f32 %v5182_v36, %v5183_v58 }
 0xb27   :  { %v5185_v60 = vand.u32 4294901760, %v5184_v59  ;;  %v12367_v59 = vsub.f32 %v5802_v13, %v5856_v54 }
 0xb29   :  { %8951 = vmatmul.mubr.f32.vlgmr.msra.gmra.mrb[14].mxu1 %v5185_v60 }
 0xb2a   :  { %10390 = vmatpush3.bf16.msra.mxu1 %v11120_v17  ;;  %8985 = vmatprep.mubr.msk.f32.mxu1 %vm10893_vm0, %v10894_v1 }
 0xb2b   :  { %10391 = vmatprep.subr.bf16.mxu1 %v10892_v0 }
 0xb2e   :  { %10393 = vmatpush3.bf16.msra.mxu1 %v11173_v16  ;;  %v5788_v16 = vld [vmem:[#allocation8 + $0x8] sm:$0xff] }
 0xb2f   :  { %10394 = vmatprep.subr.bf16.mxu1 %v10892_v0 }
 0xb32   :  { %10396 = vmatpush3.bf16.msra.mxu1 %v11211_v18  ;;  %v5789_v18 = vld [vmem:[#allocation8 + $0x10] sm:$0xff] }
 0xb33   :  { %10397 = vmatprep.subr.bf16.mxu1 %v10892_v0 }
 0xb36   :  { %10399 = vmatpush3.bf16.msra.mxu1 %v11222_v10  ;;  %v5790_v10 = vld [vmem:[#allocation8 + $0x18] sm:$0xff] }
 0xb37   :  { %10400 = vmatprep.subr.bf16.mxu1 %v10892_v0 }
 0xb3a   :  { %10402 = vmatpush3.bf16.msra.mxu1 %v11277_v49  ;;  %v5794_v49 = vld [vmem:[#allocation8 + $0x38] sm:$0xff] }
 0xb3b   :  { %10403 = vmatprep.subr.bf16.mxu1 %v10892_v0 }
 0xb3e   :  { %10405 = vmatpush3.bf16.msra.mxu1 %v11290_v42  ;;  %v5832_v42 = vand.u32 4294901760, %v5794_v49 }
 0xb3f   :  { %10406 = vmatprep.subr.bf16.mxu1 %v10892_v0 }
 0xb40   :  { %v12343_v40 = vsub.f32 %v5794_v49, %v5832_v42 }
 0xb42   :  { %10408 = vmatpush3.bf16.msra.mxu1 %v11304_v4  ;;  %v5795_v4 = vld [vmem:[#allocation8 + $0x40] sm:$0xff] }
 0xb43   :  { %10409 = vmatprep.subr.bf16.mxu1 %v10892_v0 }
 0xb46   :  { %10411 = vmatpush3.bf16.msra.mxu1 %v11316_v62  ;;  %v5835_v62 = vand.u32 4294901760, %v5795_v4 }
 0xb47   :  { %10412 = vmatprep.subr.bf16.mxu1 %v10892_v0 }
 0xb48   :  { %v12345_v14 = vsub.f32 %v5795_v4, %v5835_v62 }
 0xb49   :  { %8986 = vmatmul.mubr.f32.vlgmr.msra.gmra.mrb[14].mxu1 %v12205_v35 }
 0xb4a   :  { %10414 = vmatpush3.bf16.msra.mxu1 %v11334_v23  ;;  %9020 = vmatprep.mubr.msk.f32.mxu1 %vm10893_vm0, %v10894_v1 }
 0xb4b   :  { %10415 = vmatprep.subr.bf16.mxu1 %v10892_v0 }
 0xb4e   :  { %10417 = vmatpush3.bf16.msra.mxu1 %v11345_v25  ;;  %v5797_v25 = vld [vmem:[#allocation8 + $0x50] sm:$0xff] }
 0xb4f   :  { %10418 = vmatprep.subr.bf16.mxu1 %v10892_v0 }
 0xb52   :  { %10420 = vmatpush3.bf16.msra.mxu1 %v11355_v19  ;;  %v5798_v19 = vld [vmem:[#allocation8 + $0x58] sm:$0xff] }
 0xb53   :  { %10421 = vmatprep.subr.bf16.mxu1 %v10892_v0 }
 0xb56   :  { %10423 = vmatpush3.bf16.msra.mxu1 %v11363_v20  ;;  %v5841_v20 = vand.u32 4294901760, %v5797_v25 }
 0xb57   :  { %10424 = vmatprep.subr.bf16.mxu1 %v10892_v0 }
 0xb58   :  { %v12349_v45 = vsub.f32 %v5797_v25, %v5841_v20 }
 0xb5a   :  { %10426 = vmatpush3.bf16.msra.mxu1 %v11371_v33  ;;  %v5844_v33 = vand.u32 4294901760, %v5798_v19 }
 0xb5b   :  { %10427 = vmatprep.subr.bf16.mxu1 %v10892_v0 }
 0xb5c   :  { %v12351_v55 = vsub.f32 %v5798_v19, %v5844_v33 }
 0xb5e   :  { %10429 = vmatpush3.bf16.msra.mxu1 %v11379_v37  ;;  %v12325_v37 = vpack.c.bf16 %v5844_v33, %v5841_v20 }
 0xb5f   :  { %10430 = vmatprep.subr.bf16.mxu1 %v10892_v0 }
 0xb62   :  { %10432 = vmatpush3.bf16.msra.mxu1 %v11387_v51  ;;  %v5799_v51 = vld [vmem:[#allocation8 + $0x60] sm:$0xff] }
 0xb63   :  { %10433 = vmatprep.subr.bf16.mxu1 %v10892_v0  ;;  %v5847_v63 = vand.u32 4294901760, %v5799_v51 }
 0xb65   :  { %v12355_v34 = vsub.f32 %v5799_v51, %v5847_v63  ;;  %v12598_v51 = vand.u32 4294901760, %v12345_v14 }
 0xb66   :  { %10435 = vmatpush3.bf16.msra.mxu1 %v11395_v52  ;;  %v5800_v52 = vld [vmem:[#allocation8 + $0x68] sm:$0xff] }
 0xb67   :  { %10436 = vmatprep.subr.bf16.mxu1 %v10892_v0  ;;  %v5850_v22 = vand.u32 4294901760, %v5800_v52 }
 0xb69   :  { %9021 = vmatmul.mubr.f32.vlgmr.msra.gmra.mrb[14].mxu1 %v5182_v36  ;;  %v12353_v30 = vpack.c.bf16 %v5850_v22, %v5847_v63  ;;  %v12357_v38 = vsub.f32 %v5800_v52, %v5850_v22  ;;  %v12362_v36 = vsub.f32 %v5801_v6, %v5853_v53  ;;  %v5961_v22 = vsub.f32 %v12345_v14, %v12598_v51 }
 0xb6a   :  { %10438 = vmatpush3.bf16.msra.mxu1 %v11168_v61  ;;  %9055 = vmatprep.mubr.msk.f32.mxu1 %vm10893_vm0, %v10894_v1 }
 0xb6b   :  { %10439 = vmatprep.subr.bf16.mxu1 %v10892_v0  ;;  %v5962_v13 = vand.u32 4294901760, %v5961_v22 }
 0xb6e   :  { %10441 = vmatpush3.bf16.msra.mxu1 %v11208_v41 }
 0xb6f   :  { %10442 = vmatprep.subr.bf16.mxu1 %v10892_v0 }
 0xb72   :  { %10444 = vmatpush3.bf16.msra.mxu1 %v11219_v15 }
 0xb73   :  { %10445 = vmatprep.subr.bf16.mxu1 %v10892_v0 }
 0xb76   :  { %10447 = vmatpush3.bf16.msra.mxu1 %v11272_v11 }
 0xb77   :  { %10448 = vmatprep.subr.bf16.mxu1 %v10892_v0 }
 0xb7a   :  { %10450 = vmatpush3.bf16.msra.mxu1 %v11286_v48 }
 0xb7b   :  { %10451 = vmatprep.subr.bf16.mxu1 %v10892_v0 }
 0xb7e   :  { %10453 = vmatpush3.bf16.msra.mxu1 %v11301_v56 }
 0xb7f   :  { %10454 = vmatprep.subr.bf16.mxu1 %v10892_v0 }
 0xb82   :  { %10456 = vmatpush3.bf16.msra.mxu1 %v11313_v57 }
 0xb83   :  { %10457 = vmatprep.subr.bf16.mxu1 %v10892_v0 }
 0xb86   :  { %10459 = vmatpush3.bf16.msra.mxu1 %v11325_v3 }
 0xb87   :  { %10460 = vmatprep.subr.bf16.mxu1 %v10892_v0 }
 0xb89   :  { %9056 = vmatmul.mubr.f32.vlgmr.msra.gmra.mrb[14].mxu1 %v5183_v58  ;;  %v12365_v58 = vpack.c.bf16 %v5856_v54, %v5853_v53  ;;  %v12596_v54 = vand.u32 4294901760, %v12349_v45 }
 0xb8a   :  { %10462 = vmatpush3.bf16.msra.mxu1 %v11234_v26  ;;  %9090 = vmatprep.mubr.msk.f32.mxu1 %vm10893_vm0, %v10894_v1  ;;  %v5817_v26 = vand.u32 4294901760, %v5789_v18 }
 0xb8b   :  { %10463 = vmatprep.subr.bf16.mxu1 %v10892_v0 }
 0xb8c   :  { %v12333_v29 = vsub.f32 %v5789_v18, %v5817_v26 }
 0xb8e   :  { %10465 = vmatpush3.bf16.msra.mxu1 %v11242_v44  ;;  %v5820_v44 = vand.u32 4294901760, %v5790_v10 }
 0xb8f   :  { %10466 = vmatprep.subr.bf16.mxu1 %v10892_v0 }
 0xb90   :  { %v12335_v5 = vsub.f32 %v5790_v10, %v5820_v44 }
 0xb92   :  { %10468 = vmatpush3.bf16.msra.mxu1 %v11248_v8  ;;  %v12309_v8 = vpack.c.bf16 %v5820_v44, %v5817_v26 }
 0xb93   :  { %10469 = vmatprep.subr.bf16.mxu1 %v10892_v0 }
 0xb96   :  { %10471 = vmatpush3.bf16.msra.mxu1 %v11256_v32  ;;  %v5791_v32 = vld [vmem:[#allocation8 + $0x20] sm:$0xff] }
 0xb97   :  { %10472 = vmatprep.subr.bf16.mxu1 %v10892_v0 }
 0xb9a   :  { %10474 = vmatpush3.bf16.msra.mxu1 %v11258_v9  ;;  %v5792_v9 = vld [vmem:[#allocation8 + $0x28] sm:$0xff] }
 0xb9b   :  { %10475 = vmatprep.subr.bf16.mxu1 %v10892_v0 }
 0xb9e   :  { %10477 = vmatpush3.bf16.msra.mxu1 %v11260_v47  ;;  %v5823_v47 = vand.u32 4294901760, %v5791_v32 }
 0xb9f   :  { %10478 = vmatprep.subr.bf16.mxu1 %v10892_v0 }
 0xba0   :  { %v12337_v43 = vsub.f32 %v5791_v32, %v5823_v47 }
 0xba2   :  { %10480 = vmatpush3.bf16.msra.mxu1 %v11264_v50  ;;  %v5826_v50 = vand.u32 4294901760, %v5792_v9 }
 0xba3   :  { %10481 = vmatprep.subr.bf16.mxu1 %v10892_v0 }
 0xba4   :  { %v12339_v12 = vsub.f32 %v5792_v9, %v5826_v50 }
 0xba6   :  { %10483 = vmatpush3.bf16.msra.mxu1 %v11266_v2  ;;  %v12313_v2 = vpack.c.bf16 %v5826_v50, %v5823_v47  ;;  %v5932_v47 = vand.u32 4294901760, %v12337_v43  ;;  %v12601_v50 = vand.u32 4294901760, %v12339_v12 }
 0xba7   :  { %10484 = vmatprep.subr.bf16.mxu1 %v10892_v0 }
 0xba8   :  { %v5933_v49 = vsub.f32 %v12337_v43, %v5932_v47 }
 0xba9   :  { %9091 = vmatmul.mubr.f32.vlgmr.msra.gmra.mrb[14].mxu1 %v12205_v35 }
 0xbaa   :  { %10486 = vmatpush3.bf16.msra.mxu1 %v11168_v61  ;;  %9125 = vmatprep.mubr.msk.f32.mxu1 %vm10893_vm0, %v10894_v1  ;;  %v5814_v61 = vand.u32 4294901760, %v5788_v16 }
 0xbab   :  { %10487 = vmatprep.subr.bf16.mxu1 %v10892_v0 }
 0xbac   :  { %v12331_v28 = vsub.f32 %v5788_v16, %v5814_v61  ;;  %v5918_v16 = vand.u32 4294901760, %v12333_v29 }
 0xbae   :  { %10489 = vmatpush3.bf16.msra.mxu1 %v11208_v41  ;;  %v5911_v24 = vand.u32 4294901760, %v12331_v28  ;;  %v5919_v10 = vsub.f32 %v12333_v29, %v5918_v16 }
 0xbaf   :  { %10490 = vmatprep.subr.bf16.mxu1 %v10892_v0 }
 0xbb0   :  { %v5920_v32 = vand.u32 4294901760, %v5919_v10 }
 0xbb2   :  { %10492 = vmatpush3.bf16.msra.mxu1 %v11219_v15  ;;  %v5787_v15 = vld [vmem:[#allocation8] sm:$0xff] }
 0xbb3   :  { %10493 = vmatprep.subr.bf16.mxu1 %v10892_v0  ;;  %v5811_v17 = vand.u32 4294901760, %v5787_v15 }
 0xbb5   :  { %v12305_v41 = vpack.c.bf16 %v5814_v61, %v5811_v17  ;;  %v12329_v27 = vsub.f32 %v5787_v15, %v5811_v17  ;;  %v5912_v15 = vsub.f32 %v12331_v28, %v5911_v24  ;;  %v5925_v17 = vand.u32 4294901760, %v12335_v5 }
 0xbb6   :  { %10495 = vmatpush3.bf16.msra.mxu1 %v11272_v11  ;;  %v5793_v11 = vld [vmem:[#allocation8 + $0x30] sm:$0xff] }
 0xbb7   :  { %10496 = vmatprep.subr.bf16.mxu1 %v10892_v0  ;;  %10510 = vmatpush3.bf16.msra.mxu0 %v12305_v41  ;;  %v5913_v18 = vand.u32 4294901760, %v5912_v15  ;;  %v5926_v26 = vsub.f32 %v12335_v5, %v5925_v17 }
 0xbb8   :  { %10511 = vmatprep.subr.bf16.mxu0 %v10892_v0 }
 0xbb9   :  { %v5927_v9 = vand.u32 4294901760, %v5926_v26 }
 0xbba   :  { %10498 = vmatpush3.bf16.msra.mxu1 %v11286_v48  ;;  %v5829_v48 = vand.u32 4294901760, %v5793_v11 }
 0xbbb   :  { %10499 = vmatprep.subr.bf16.mxu1 %v10892_v0  ;;  %10513 = vmatpush3.bf16.msra.mxu0 %v12309_v8 }
 0xbbc   :  { %10514 = vmatprep.subr.bf16.mxu0 %v10892_v0  ;;  %v12341_v39 = vsub.f32 %v5793_v11, %v5829_v48  ;;  %v12389_v11 = vpack.c.bf16 %v5927_v9, %v5920_v32  ;;  %v12594_v32 = vand.u32 4294901760, %v12355_v34  ;;  %v12593_v9 = vand.u32 4294901760, %v12357_v38 }
 0xbbe   :  { %10501 = vmatpush3.bf16.msra.mxu1 %v11301_v56  ;;  %v12317_v56 = vpack.c.bf16 %v5832_v42, %v5829_v48  ;;  %v5940_v48 = vsub.f32 %v12339_v12, %v12601_v50  ;;  %v5934_v42 = vand.u32 4294901760, %v5933_v49 }
 0xbbf   :  { %10502 = vmatprep.subr.bf16.mxu1 %v10892_v0  ;;  %10516 = vmatpush3.bf16.msra.mxu0 %v12313_v2 }
 0xbc0   :  { %10517 = vmatprep.subr.bf16.mxu0 %v10892_v0  ;;  %v5941_v4 = vand.u32 4294901760, %v5940_v48  ;;  %v5989_v48 = vsub.f32 %v12355_v34, %v12594_v32  ;;  %v5746_v32 = vmul.f32 0.7, %v12202_v7  ;;  %v10608_v7 = vpack.c.bf16 %v5925_v17, %v5918_v16 }
 0xbc2   :  { %10504 = vmatpush3.bf16.msra.mxu1 %v11313_v57  ;;  %v5796_v57 = vld [vmem:[#allocation8 + $0x48] sm:$0xff] }
 0xbc3   :  { %10505 = vmatprep.subr.bf16.mxu1 %v10892_v0  ;;  %10519 = vmatpush3.bf16.msra.mxu0 %v12317_v56 }
 0xbc4   :  { %10520 = vmatprep.subr.bf16.mxu0 %v10892_v0 }
 0xbc6   :  { %10507 = vmatpush3.bf16.msra.mxu1 %v11325_v3  ;;  %v5838_v3 = vand.u32 4294901760, %v5796_v57 }
 0xbc8   :  { %v12321_v23 = vpack.c.bf16 %v5838_v3, %v5835_v62  ;;  %v12347_v21 = vsub.f32 %v5796_v57, %v5838_v3  ;;  %v12600_v57 = vand.u32 4294901760, %v12341_v39  ;;  %v12599_v62 = vand.u32 4294901760, %v12343_v40 }
 0xbc9   :  { %9126 = vmatmul.mubr.f32.vlgmr.msra.gmra.mrb[14].mxu1 %v12205_v35  ;;  %v5904_v35 = vand.u32 4294901760, %v12329_v27  ;;  %v12399_v3 = vpack.c.bf16 %v5941_v4, %v5934_v42  ;;  %v5996_v42 = vsub.f32 %v12357_v38, %v12593_v9  ;;  %v5990_v4 = vand.u32 4294901760, %v5989_v48 }
 0xbca   :  { %10522 = vmatpush3.bf16.msra.mxu0 %v12321_v23  ;;  %v5947_v25 = vsub.f32 %v12341_v39, %v12600_v57  ;;  %v5954_v19 = vsub.f32 %v12343_v40, %v12599_v62  ;;  %v12597_v52 = vand.u32 4294901760, %v12347_v21  ;;  %v10566_v48 = vpack.c.bf16 %v12343_v40, %v12341_v39 }
 0xbcb   :  { %10523 = vmatprep.subr.bf16.mxu0 %v10892_v0  ;;  %v5905_v60 = vsub.f32 %v12329_v27, %v5904_v35 }
 0xbcc   :  { %v5948_v20 = vand.u32 4294901760, %v5947_v25  ;;  %v5955_v33 = vand.u32 4294901760, %v5954_v19  ;;  %v5968_v6 = vsub.f32 %v12347_v21, %v12597_v52  ;;  %v5997_v25 = vand.u32 4294901760, %v5996_v42 }
 0xbcd   :  { %v5906_v61 = vand.u32 4294901760, %v5905_v60  ;;  %v12595_v60 = vand.u32 4294901760, %v12351_v55  ;;  %v12592_v19 = vand.u32 4294901760, %v12362_v36  ;;  %v10569_v42 = vpack.c.bf16 %v12347_v21, %v12345_v14 }
 0xbce   :  { %10525 = vmatpush3.bf16.msra.mxu0 %v12325_v37  ;;  %v10542_v63 = vpack.c.bf16 %v5955_v33, %v5948_v20  ;;  %v5969_v53 = vand.u32 4294901760, %v5968_v6  ;;  %v12591_v20 = vand.u32 4294901760, %v12367_v59  ;;  %v10551_v33 = vpack.c.bf16 %v5997_v25, %v5990_v4 }
 0xbcf   :  { %10526 = vmatprep.subr.bf16.mxu0 %v10892_v0  ;;  %v12385_v44 = vpack.c.bf16 %v5913_v18, %v5906_v61  ;;  %v5975_v61 = vsub.f32 %v12349_v45, %v12596_v54  ;;  %v5982_v18 = vsub.f32 %v12351_v55, %v12595_v60  ;;  %v6003_v22 = vsub.f32 %v12362_v36, %v12592_v19 }
 0xbd0   :  { %v10545_v15 = vpack.c.bf16 %v5969_v53, %v5962_v13  ;;  %v6010_v6 = vsub.f32 %v12367_v59, %v12591_v20  ;;  %v10572_v4 = vpack.c.bf16 %v12351_v55, %v12349_v45  ;;  %v10575_v25 = vpack.c.bf16 %v12357_v38, %v12355_v34 }
 0xbd1   :  { %v5976_v10 = vand.u32 4294901760, %v5975_v61  ;;  %v5983_v26 = vand.u32 4294901760, %v5982_v18  ;;  %v6004_v13 = vand.u32 4294901760, %v6003_v22  ;;  %v10557_v18 = vpack.c.bf16 %v12331_v28, %v12329_v27 }
 0xbd2   :  { %10528 = vmatpush3.bf16.msra.mxu0 %v12353_v30  ;;  %v6011_v53 = vand.u32 4294901760, %v6010_v6  ;;  %v10578_v22 = vpack.c.bf16 %v12367_v59, %v12362_v36  ;;  %v12609_v28 = vand.u32 4294901760, %v12341_v39  ;;  %v12615_v39 = vand.u32 4294901760, %v12355_v34 }
 0xbd3   :  { %10529 = vmatprep.subr.bf16.mxu0 %v10892_v0  ;;  %v10548_v49 = vpack.c.bf16 %v5983_v26, %v5976_v10  ;;  %v10560_v10 = vpack.c.bf16 %v12335_v5, %v12333_v29  ;;  %v10563_v26 = vpack.c.bf16 %v12339_v12, %v12337_v43  ;;  %v12610_v29 = vand.u32 4294901760, %v12343_v40 }
 0xbd4   :  { %v10554_v61 = vpack.c.bf16 %v6011_v53, %v6004_v13  ;;  %v12613_v43 = vand.u32 4294901760, %v12349_v45  ;;  %v12616_v40 = vand.u32 4294901760, %v12357_v38 }
 0xbd5   :  { %v10614_v5 = vpack.c.bf16 %v12610_v29, %v12609_v28 }
 0xbd6   :  { %10531 = vmatpush3.bf16.msra.mxu0 %v12365_v58 }
 0xbd7   :  { %10532 = vmatprep.subr.bf16.mxu0 %v10892_v0 }
 0xc9c   :  { %v5737_v6 = vpop.f32.mrb[14].mxu1 }
 0xc9d   :  { %v5742_v13 = vrot.slane %v5737_v6, 1  ;;  %v9127_v53 = vpop.f32.mrb[15].mxu1 }
 0xc9f   :  { %v5744_v20 = vadd.f32 %v11478_v31, %v5742_v13  ;;  %v10605_v31 = vpack.c.bf16 %v5911_v24, %v5904_v35  ;;  %v12611_v35 = vand.u32 4294901760, %v12345_v14  ;;  %v12612_v24 = vand.u32 4294901760, %v12347_v21 }
 0xca0   :  { %v12617_v14 = vand.u32 4294901760, %v12362_v36  ;;  %v12618_v21 = vand.u32 4294901760, %v12367_v59 }
 0xca1   :  { %10766 = vtanh.f32 %v5744_v20  ;;  %v10617_v16 = vpack.c.bf16 %v12612_v24, %v12611_v35 }
 0xcab   :  { %v10767_v19 = vpop.eup %10766 }
 0xcac   :  { %v5747_v9 = vmul.f32 0.3, %v10767_v19 }
 0xcae   :  { %v5749_v60 = vrot.slane %v5747_v9, 7 }
 0xcb0   :  { %v5751_v54 = vadd.f32 %v5749_v60, %v5746_v32 }
 0xcb2   :  { %v5771_v52 = vrot.slane %v5751_v54, 1 }
 0xcb4   :  { %v5786_v51 = vsel %vm5785_vm8, %v12211_v46, %v5771_v52  ;;  %v12608_v46 = vand.u32 4294901760, %v12339_v12  ;;  %v12614_v12 = vand.u32 4294901760, %v12351_v55 }
 0xcb5   :  { %v12458_v62 = vand.u32 4294901760, %v5786_v51 }
 0xcb6   :  { %v10611_v27 = vpack.c.bf16 %v12608_v46, %v5932_v47  ;;  %v10620_v17 = vpack.c.bf16 %v12614_v12, %v12613_v43  ;;  %v10626_v47 = vpack.c.bf16 %v12618_v21, %v12617_v14 }
 0xcb7   :  { %v5892_v57 = vsub.f32 %v5786_v51, %v12458_v62 }
 0xcb9   :  { %v5893_v50 = vand.u32 4294901760, %v5892_v57 }
 0xcbb   :  { %v5894_v6 = vsub.f32 %v5892_v57, %v5893_v50 }
 0xcbd   :  { %v5895_v53 = vand.u32 4294901760, %v5894_v6 }
 0xcbf   :  { %9161 = vmatmul.mubr.f32.vlgmr.msra.gmra.mrb[14].mxu0 %v5895_v53 }
 0xcc0   :  { %10534 = vmatpush3.bf16.msra.mxu0 %v12385_v44  ;;  %9195 = vmatprep.mubr.msk.f32.mxu0 %vm10893_vm0, %v10894_v1  ;;  %v10623_v44 = vpack.c.bf16 %v12616_v40, %v12615_v39 }
 0xcc1   :  { %10535 = vmatprep.subr.bf16.mxu0 %v10892_v0 }
 0xcc4   :  { %10537 = vmatpush3.bf16.msra.mxu0 %v12389_v11 }
 0xcc5   :  { %10538 = vmatprep.subr.bf16.mxu0 %v10892_v0 }
 0xcc8   :  { %10540 = vmatpush3.bf16.msra.mxu0 %v12399_v3 }
 0xcc9   :  { %10541 = vmatprep.subr.bf16.mxu0 %v10892_v0 }
 0xccc   :  { %10543 = vmatpush3.bf16.msra.mxu0 %v10542_v63 }
 0xccd   :  { %10544 = vmatprep.subr.bf16.mxu0 %v10892_v0 }
 0xcd0   :  { %10546 = vmatpush3.bf16.msra.mxu0 %v10545_v15 }
 0xcd1   :  { %10547 = vmatprep.subr.bf16.mxu0 %v10892_v0 }
 0xcd4   :  { %10549 = vmatpush3.bf16.msra.mxu0 %v10548_v49 }
 0xcd5   :  { %10550 = vmatprep.subr.bf16.mxu0 %v10892_v0 }
 0xcd8   :  { %10552 = vmatpush3.bf16.msra.mxu0 %v10551_v33 }
 0xcd9   :  { %10553 = vmatprep.subr.bf16.mxu0 %v10892_v0 }
 0xcdc   :  { %10555 = vmatpush3.bf16.msra.mxu0 %v10554_v61 }
 0xcdd   :  { %10556 = vmatprep.subr.bf16.mxu0 %v10892_v0 }
 0xcdf   :  { %9196 = vmatmul.mubr.f32.vlgmr.msra.gmra.mrb[14].mxu0 %v12458_v62 }
 0xce0   :  { %10558 = vmatpush3.bf16.msra.mxu0 %v10557_v18  ;;  %9230 = vmatprep.mubr.msk.f32.mxu0 %vm10893_vm0, %v10894_v1 }
 0xce1   :  { %10559 = vmatprep.subr.bf16.mxu0 %v10892_v0 }
 0xce4   :  { %10561 = vmatpush3.bf16.msra.mxu0 %v10560_v10 }
 0xce5   :  { %10562 = vmatprep.subr.bf16.mxu0 %v10892_v0 }
 0xce8   :  { %10564 = vmatpush3.bf16.msra.mxu0 %v10563_v26 }
 0xce9   :  { %10565 = vmatprep.subr.bf16.mxu0 %v10892_v0 }
 0xcec   :  { %10567 = vmatpush3.bf16.msra.mxu0 %v10566_v48 }
 0xced   :  { %10568 = vmatprep.subr.bf16.mxu0 %v10892_v0 }
 0xcf0   :  { %10570 = vmatpush3.bf16.msra.mxu0 %v10569_v42 }
 0xcf1   :  { %10571 = vmatprep.subr.bf16.mxu0 %v10892_v0 }
 0xcf4   :  { %10573 = vmatpush3.bf16.msra.mxu0 %v10572_v4 }
 0xcf5   :  { %10574 = vmatprep.subr.bf16.mxu0 %v10892_v0 }
 0xcf8   :  { %10576 = vmatpush3.bf16.msra.mxu0 %v10575_v25 }
 0xcf9   :  { %10577 = vmatprep.subr.bf16.mxu0 %v10892_v0 }
 0xcfc   :  { %10579 = vmatpush3.bf16.msra.mxu0 %v10578_v22 }
 0xcfd   :  { %10580 = vmatprep.subr.bf16.mxu0 %v10892_v0 }
 0xcff   :  { %9231 = vmatmul.mubr.f32.vlgmr.msra.gmra.mrb[14].mxu0 %v5892_v57 }
 0xd00   :  { %10582 = vmatpush3.bf16.msra.mxu0 %v12305_v41  ;;  %9265 = vmatprep.mubr.msk.f32.mxu0 %vm10893_vm0, %v10894_v1 }
 0xd01   :  { %10583 = vmatprep.subr.bf16.mxu0 %v10892_v0 }
 0xd04   :  { %10585 = vmatpush3.bf16.msra.mxu0 %v12309_v8 }
 0xd05   :  { %10586 = vmatprep.subr.bf16.mxu0 %v10892_v0 }
 0xd08   :  { %10588 = vmatpush3.bf16.msra.mxu0 %v12313_v2 }
 0xd09   :  { %10589 = vmatprep.subr.bf16.mxu0 %v10892_v0 }
 0xd0c   :  { %10591 = vmatpush3.bf16.msra.mxu0 %v12317_v56 }
 0xd0d   :  { %10592 = vmatprep.subr.bf16.mxu0 %v10892_v0 }
 0xd10   :  { %10594 = vmatpush3.bf16.msra.mxu0 %v12321_v23 }
 0xd11   :  { %10595 = vmatprep.subr.bf16.mxu0 %v10892_v0 }
 0xd14   :  { %10597 = vmatpush3.bf16.msra.mxu0 %v12325_v37 }
 0xd15   :  { %10598 = vmatprep.subr.bf16.mxu0 %v10892_v0 }
 0xd18   :  { %10600 = vmatpush3.bf16.msra.mxu0 %v12353_v30 }
 0xd19   :  { %10601 = vmatprep.subr.bf16.mxu0 %v10892_v0 }
 0xd1c   :  { %10603 = vmatpush3.bf16.msra.mxu0 %v12365_v58 }
 0xd1d   :  { %10604 = vmatprep.subr.bf16.mxu0 %v10892_v0 }
 0xd1f   :  { %9266 = vmatmul.mubr.f32.vlgmr.msra.gmra.mrb[14].mxu0 %v5893_v50 }
 0xd20   :  { %10606 = vmatpush3.bf16.msra.mxu0 %v10605_v31  ;;  %9300 = vmatprep.mubr.msk.f32.mxu0 %vm10893_vm0, %v10894_v1 }
 0xd21   :  { %10607 = vmatprep.subr.bf16.mxu0 %v10892_v0 }
 0xd24   :  { %10609 = vmatpush3.bf16.msra.mxu0 %v10608_v7 }
 0xd25   :  { %10610 = vmatprep.subr.bf16.mxu0 %v10892_v0 }
 0xd28   :  { %10612 = vmatpush3.bf16.msra.mxu0 %v10611_v27 }
 0xd29   :  { %10613 = vmatprep.subr.bf16.mxu0 %v10892_v0 }
 0xd2c   :  { %10615 = vmatpush3.bf16.msra.mxu0 %v10614_v5 }
 0xd2d   :  { %10616 = vmatprep.subr.bf16.mxu0 %v10892_v0 }
 0xd30   :  { %10618 = vmatpush3.bf16.msra.mxu0 %v10617_v16 }
 0xd31   :  { %10619 = vmatprep.subr.bf16.mxu0 %v10892_v0 }
 0xd34   :  { %10621 = vmatpush3.bf16.msra.mxu0 %v10620_v17 }
 0xd35   :  { %10622 = vmatprep.subr.bf16.mxu0 %v10892_v0 }
 0xd38   :  { %10624 = vmatpush3.bf16.msra.mxu0 %v10623_v44 }
 0xd39   :  { %10625 = vmatprep.subr.bf16.mxu0 %v10892_v0 }
 0xd3c   :  { %10627 = vmatpush3.bf16.msra.mxu0 %v10626_v47 }
 0xd3d   :  { %10628 = vmatprep.subr.bf16.mxu0 %v10892_v0 }
 0xd3f   :  { %9301 = vmatmul.mubr.f32.vlgmr.msra.gmra.mrb[14].mxu0 %v12458_v62 }
 0xd40   :  { %10630 = vmatpush3.bf16.msra.mxu0 %v12305_v41  ;;  %9335 = vmatprep.mubr.msk.f32.mxu0 %vm10893_vm0, %v10894_v1  ;;  %v6469_v1 = vld [vmem:[%s12583_s4] ss:$0 sm:$0xff] }
 0xd41   :  { %10631 = vmatprep.subr.bf16.mxu0 %v10892_v0 }
 0xd44   :  { %10633 = vmatpush3.bf16.msra.mxu0 %v12309_v8 }
 0xd45   :  { %10634 = vmatprep.subr.bf16.mxu0 %v10892_v0 }
 0xd48   :  { %10636 = vmatpush3.bf16.msra.mxu0 %v12313_v2 }
 0xd49   :  { %10637 = vmatprep.subr.bf16.mxu0 %v10892_v0 }
 0xd4c   :  { %10639 = vmatpush3.bf16.msra.mxu0 %v12317_v56 }
 0xd4d   :  { %10640 = vmatprep.subr.bf16.mxu0 %v10892_v0 }
 0xd50   :  { %10642 = vmatpush3.bf16.msra.mxu0 %v12321_v23 }
 0xd51   :  { %10643 = vmatprep.subr.bf16.mxu0 %v10892_v0 }
 0xd54   :  { %10645 = vmatpush3.bf16.msra.mxu0 %v12325_v37 }
 0xd55   :  { %10646 = vmatprep.subr.bf16.mxu0 %v10892_v0 }
 0xd58   :  { %10648 = vmatpush3.bf16.msra.mxu0 %v12353_v30 }
 0xd59   :  { %10649 = vmatprep.subr.bf16.mxu0 %v10892_v0 }
 0xd5c   :  { %10651 = vmatpush3.bf16.msra.mxu0 %v12365_v58 }
 0xd5f   :  { %9336 = vmatmul.mubr.f32.vlgmr.msra.gmra.mrb[14].mxu0 %v12458_v62 }
 0xe32   :  { %v6447_v41 = vpop.f32.mrb[14].mxu0 }
 0xe33   :  { %v10653_v8 = vadd.f32 %v6469_v1, %v6447_v41  ;;  %v9337_v2 = vpop.f32.mrb[15].mxu0 }
 0xe35   :  { %6451 = vst [vmem:[#allocation10] sm:$0xff] %v10653_v8 }
 0xe36   :  { %10867 = shalt.err (!%p10864_p8)
}
 0xe37   :  { %s10868_s20 = scalar_lea.hbm %s12584_s5, 128 }
 0xe38   :  { %p10869_p9 = scmp.ne.s32.totalorder %s12584_s5, %s10868_s20  ;;  %p10872_p10 = scmp.lt.u32.totalorder %s10868_s20, %s12584_s5 }
 0xe3a   :  { %p10874_p11 = pnand %p10872_p10, %p10869_p9 }
 0xe3c   :  { %10877 = shalt.err (!%p10874_p11)
}
 0xe3d   :  { %6461 = dma.vmem_to_hbm [thread:$0]  %s6459_s17, 128, %s12584_s5, [#allocation4]  }
 0xe3e   :  { %10884 = dma.done.wait [#allocation4], 128  }
 0xe3f   :  { %10885 = vsyncadd [#allocation4], 4294967168 }
 0xe40   :  { %6465 = vsyncpa [#allocation3], 1 }
 0xe41   :  { %6466 = vsyncpa [#allocation6], 1 }
 0xe42   :  { %6467 = vsyncpa [#allocation9], 1 }
 0xe43   :  { %6468 = vsyncpa [#allocation4], 1 }

</bundles_post_ra>
